<compile_context>
chip_gen: v5e
topology: v5e:2x2
jax: 0.10.0
libtpu: 0.0.40
codegen_flags: <defaults>
</compile_context>

<pallas_src>
import functools
import math

import jax
import jax.numpy as jnp
from jax.experimental import pallas as pl
from jax.experimental.pallas import tpu as pltpu


def _vmem_capacity_bytes():
    try:
        return int(pltpu.get_tpu_info().vmem_capacity_bytes)
    except Exception:
        return 64 << 20  # conservative fallback (v7x per-TensorCore VMEM)


def _choose_block_batch(B, N, L, D, x_itemsize, pool_chunk, vmem_capacity):
    """Bags per grid step: HBM-efficient (multi-MiB x blocks), VMEM-bounded."""
    align = 8
    if B <= align:
        return B  # single step; blocks cover the full (small) batch axis
    bag_bytes = N * L * x_itemsize
    # Per-bag VMEM footprint of one grid step: x (double-buffered) + in-kernel
    # temporaries (h f32, bf16 MXU operand worst case, pooling chunk, pooled
    # accumulator) + double-buffered outputs.
    per_bag_vmem = (2 * bag_bytes
                    + N * D * 4
                    + N * L * 2
                    + pool_chunk * L * 4
                    + L * 4
                    + 2 * (L + N) * 4)
    budget = max(8 << 20, int(0.6 * vmem_capacity))
    bt_vmem = max(align, (budget // per_bag_vmem) // align * align)
    # HBM-efficiency target: ~4 MiB x buffers; MXU target: >= 256-row LHS.
    bt_target = max(pl.cdiv(4 << 20, bag_bytes), pl.cdiv(256, N))
    bt_target = max(align, pl.cdiv(bt_target, align) * align)
    bt = min(bt_vmem, bt_target)
    b_ceil = pl.cdiv(B, align) * align
    bt = min(bt, b_ceil)
    # keep >= 2 grid steps when the batch allows it (pipelining / megacore)
    if b_ceil >= 2 * align:
        bt = min(bt, max(align, (b_ceil // 2) // align * align))
    # prefer an even number of grid steps (v7x shards the parallel axis across
    # 2 TensorCores); accept only a modest shrink of the block to achieve it.
    g = pl.cdiv(B, bt)
    if g > 1 and g % 2 == 1:
        cand = bt - align
        while cand >= align and 2 * cand >= bt:
            if pl.cdiv(B, cand) % 2 == 0:
                bt = cand
                break
            cand -= align
    return bt


def _dattn_kernel(x_ref, w1_ref, w2_ref, *out_refs, n_valid, mxu_dtype, pool_chunk):
    # x_ref:  (BT, N, L)  block of BT bags (HBM dtype, typically f32)
    # w1_ref: (L, D)      first Linear weight (transposed vs torch's (D, L))
    # w2_ref: (1, D)      second Linear weight (torch layout, K = 1)
    # out_refs[0]: (BT, L) pooled output
    # out_refs[1]: (BT, N) attention weights (only present when requested)
    out_ref = out_refs[0]
    attn_ref = out_refs[1] if len(out_refs) > 1 else None

    BT, N, L = x_ref.shape
    D = w1_ref.shape[1]

    x = x_ref[...]                                        # (BT, N, L)
    x2 = x.reshape(BT * N, L)
    if mxu_dtype is not None:
        x2 = x2.astype(mxu_dtype)                         # MXU operand only (in-kernel cast)

    # attention[0] + ReLU: Linear(L->D, bias=False) as one big MXU matmul
    h = jnp.dot(x2, w1_ref[...], preferred_element_type=jnp.float32)   # (BT*N, D) f32
    h = jnp.maximum(h, 0.0)

    # attention[2]: Linear(D->1, bias=False) as VPU multiply + lane reduce
    w2 = w2_ref[...].astype(jnp.float32)                  # (1, D)
    s = jnp.sum(h.reshape(BT, N, D) * w2[None, :, :], axis=-1)          # (BT, N)

    # mask padded instances (N was padded up to a sublane tile)
    if n_valid is not None and n_valid < N:
        col = jax.lax.broadcasted_iota(jnp.int32, (BT, N), 1)
        s = jnp.where(col < n_valid, s, jnp.float32(-1e30))

    # softmax over the N instances of each bag (== softmax(A^T, dim=-1))
    m = jnp.max(s, axis=-1, keepdims=True)
    e = jnp.exp(s - m)
    a = e * pl.reciprocal(jnp.sum(e, axis=-1, keepdims=True), approx=True)  # (BT, N)

    # weighted pooling out[b] = sum_n a[b,n] * x[b,n,:]; chunked over N so the
    # f32 product temporary stays small (VPU multiply, f32 accumulation).
    pooled = jnp.zeros((BT, L), jnp.float32)
    for c0 in range(0, N, pool_chunk):
        c1 = min(c0 + pool_chunk, N)
        xs = x[:, c0:c1, :].astype(jnp.float32)           # (BT, cn, L)
        ws = a[:, c0:c1]                                  # (BT, cn)
        pooled = pooled + jnp.sum(ws[:, :, None] * xs, axis=1)

    out_ref[...] = pooled.astype(out_ref.dtype)
    if attn_ref is not None:
        attn_ref[...] = a.astype(attn_ref.dtype)


@functools.partial(jax.jit, static_argnames=("return_attn", "use_bf16_matmul"))
def dattention_forward(x, w1, w2, return_attn=False, use_bf16_matmul=False):
    """DAttention forward (gated=False, act='relu', bias=False, dropout=False).

    x : (B, N, L)  bags of N instances with L features
    w1: (L, D)     attention[0] Linear weight (transposed vs torch (D, L))
    w2: (1, D)     attention[2] Linear weight (torch layout, K = 1)
    """
    B, N, L = x.shape
    D = w1.shape[1]
    out_dtype = x.dtype
    x_itemsize = jnp.dtype(x.dtype).itemsize

    # bf16 MXU fast path: x is cast inside the kernel (single f32 HBM pass,
    # pooling on full-precision x); only the tiny, reused w1 is cast here.
    mxu_dtype = jnp.bfloat16 if use_bf16_matmul else None
    if use_bf16_matmul:
        w1 = w1.astype(jnp.bfloat16)

    # pad L to the lane tile (128) and N to the input dtype's sublane tile so
    # in-kernel reshapes are layout-free and pooled-output stores unmasked.
    sub = 16 if x_itemsize == 2 else 8
    l_pad = pl.cdiv(L, 128) * 128
    n_pad = pl.cdiv(N, sub) * sub
    if l_pad != L:
        x = jnp.pad(x, ((0, 0), (0, 0), (0, l_pad - L)))
        w1 = jnp.pad(w1, ((0, l_pad - L), (0, 0)))
    if n_pad != N:
        x = jnp.pad(x, ((0, 0), (0, n_pad - N), (0, 0)))

    # pooling chunk: multiple of the sublane tile, <= ~32 unrolled iterations
    pool_chunk = sub * max(1, pl.cdiv(pl.cdiv(n_pad, sub), 32))

    vmem_capacity = _vmem_capacity_bytes()
    bt = _choose_block_batch(B, n_pad, l_pad, D, x_itemsize, pool_chunk, vmem_capacity)
    g = pl.cdiv(B, bt)
    b_pad = g * bt
    if b_pad != B:
        x = jnp.pad(x, ((0, b_pad - B), (0, 0), (0, 0)))

    out_shapes = [jax.ShapeDtypeStruct((b_pad, l_pad), out_dtype)]
    out_specs = [pl.BlockSpec((bt, l_pad), lambda i: (i, 0))]
    if return_attn:
        out_shapes.append(jax.ShapeDtypeStruct((b_pad, n_pad), out_dtype))
        out_specs.append(pl.BlockSpec((bt, n_pad), lambda i: (i, 0)))

    w1_item = jnp.dtype(w1.dtype).itemsize
    out_item = jnp.dtype(out_dtype).itemsize
    # VMEM accounting: double-buffered x/outputs/weights + f32 temporaries.
    vmem_need = (2 * bt * n_pad * l_pad * x_itemsize
                 + (bt * n_pad * l_pad * 2 if use_bf16_matmul else 0)
                 + bt * n_pad * D * 4
                 + bt * pool_chunk * l_pad * 4
                 + bt * l_pad * 4
                 + 2 * (l_pad * D * w1_item + D * 4)
                 + 2 * bt * (l_pad + n_pad) * out_item)
    vmem_limit = int(min(int(0.92 * vmem_capacity),
                         max(32 << 20, vmem_need + (8 << 20))))

    flops = (2 * b_pad * n_pad * l_pad * D      # Linear(L->D)
             + 2 * b_pad * n_pad * D            # Linear(D->1)
             + 2 * b_pad * n_pad * l_pad)       # pooling
    bytes_accessed = (b_pad * n_pad * l_pad * x_itemsize
                      + l_pad * D * w1_item + D * 4
                      + sum(math.prod(s.shape) * jnp.dtype(s.dtype).itemsize
                            for s in out_shapes))

    kernel = functools.partial(
        _dattn_kernel,
        n_valid=(N if n_pad != N else None),
        mxu_dtype=mxu_dtype,
        pool_chunk=pool_chunk)

    results = pl.pallas_call(
        kernel,
        out_shape=tuple(out_shapes),
        grid_spec=pltpu.PrefetchScalarGridSpec(
            num_scalar_prefetch=0,
            grid=(g,),
            in_specs=[
                pl.BlockSpec((bt, n_pad, l_pad), lambda i: (i, 0, 0)),
                pl.BlockSpec((l_pad, D), lambda i: (0, 0)),
                pl.BlockSpec((1, D), lambda i: (0, 0)),
            ],
            out_specs=out_specs,
        ),
        compiler_params=pltpu.CompilerParams(
            dimension_semantics=("parallel",),
            vmem_limit_bytes=vmem_limit,
        ),
        cost_estimate=pl.CostEstimate(
            flops=flops, transcendentals=b_pad * n_pad,
            bytes_accessed=bytes_accessed),
    )(x, w1, w2)

    out = results[0][:B, :L]
    if return_attn:
        return out, results[1][:B, :N]
    return out


def _reference_forward(x, w1, w2):
    # plain-JAX reference mirroring the PyTorch module
    h = jnp.maximum(jnp.einsum("bnl,ld->bnd", x, w1), 0.0)
    s = jnp.einsum("bnd,kd->bnk", h, w2)             # (B, N, 1)
    a = jax.nn.softmax(jnp.swapaxes(s, -1, -2), -1)  # (B, 1, N)
    out = jnp.einsum("bkn,bnl->bkl", a, x)           # (B, 1, L)
    return out[:, 0, :], a[:, 0, :]


if __name__ == "__main__":
    # D = 128 is fixed by the module __init__; small L/N/B for the demo.
    B, N, L, D = 32, 16, 256, 128

    key = jax.random.PRNGKey(0)
    kx, k1, k2, kx2, k3, k4 = jax.random.split(key, 6)

    x = jax.random.normal(kx, (B, N, L), dtype=jnp.float32)
    bound1 = 1.0 / math.sqrt(L)
    bound2 = 1.0 / math.sqrt(D)
    w1 = jax.random.uniform(k1, (L, D), jnp.float32, -bound1, bound1)  # torch weight.T
    w2 = jax.random.uniform(k2, (1, D), jnp.float32, -bound2, bound2)  # torch weight

    ref_out, ref_attn = _reference_forward(x, w1, w2)

    # f32 path with attention returned
    out, attn = jax.block_until_ready(
        dattention_forward(x, w1, w2, return_attn=True))
    assert out.shape == (B, L) and attn.shape == (B, N)
    assert jnp.allclose(out, ref_out, atol=5e-3, rtol=5e-3)
    assert jnp.allclose(attn, ref_attn, atol=5e-3, rtol=5e-3)

    # pooled-only path (attention output skipped entirely)
    out_only = jax.block_until_ready(dattention_forward(x, w1, w2))
    assert out_only.shape == (B, L)
    assert jnp.allclose(out_only, ref_out, atol=5e-3, rtol=5e-3)

    # bf16-MXU fast path (in-kernel cast, f32 pooling); looser tolerance
    out_bf16 = jax.block_until_ready(
        dattention_forward(x, w1, w2, use_bf16_matmul=True))
    assert jnp.allclose(out_bf16, ref_out, atol=5e-2, rtol=5e-2)

    # unaligned shapes exercise the N/L padding + instance-masking path
    B2, N2, L2 = 10, 12, 200
    x2 = jax.random.normal(kx2, (B2, N2, L2), dtype=jnp.float32)
    bound1b = 1.0 / math.sqrt(L2)
    w1b = jax.random.uniform(k3, (L2, D), jnp.float32, -bound1b, bound1b)
    w2b = jax.random.uniform(k4, (1, D), jnp.float32, -bound2, bound2)
    ref_out2, ref_attn2 = _reference_forward(x2, w1b, w2b)
    out2, attn2 = jax.block_until_ready(
        dattention_forward(x2, w1b, w2b, return_attn=True))
    assert out2.shape == (B2, L2) and attn2.shape == (B2, N2)
    assert jnp.allclose(out2, ref_out2, atol=5e-3, rtol=5e-3)
    assert jnp.allclose(attn2, ref_attn2, atol=5e-3, rtol=5e-3)

    print("KERNEL_OK")
</pallas_src>

<mosaic_0001>
module attributes {stable_mosaic.version = 11 : i64} {
  func.func @_dattn_kernel(%arg0: i32, %arg1: memref<16x16x256xf32, #tpu.memory_space<vmem>>, %arg2: memref<256x128xf32, #tpu.memory_space<vmem>>, %arg3: memref<1x128xf32, #tpu.memory_space<vmem>>, %arg4: memref<16x256xf32, #tpu.memory_space<vmem>>, %arg5: memref<16x16xf32, #tpu.memory_space<vmem>>) attributes {dimension_semantics = [#tpu.dimension_semantics<parallel>], iteration_bounds = array<i64: 2>, scalar_prefetch = 0 : i64, scratch_operands = 0 : i64, tpu.core_type = #tpu.core_type<tc>, window_params = [{transform_indices = @transform_0, window_bounds = array<i64: 16, 16, 256>}, {pipeline_mode = #tpu.pipeline_mode<synchronous>, transform_indices = @transform_1, window_bounds = array<i64: 256, 128>}, {pipeline_mode = #tpu.pipeline_mode<synchronous>, transform_indices = @transform_2, window_bounds = array<i64: 1, 128>}, {transform_indices = @transform_3, window_bounds = array<i64: 16, 256>}, {transform_indices = @transform_4, window_bounds = array<i64: 16, 16>}]} {
    %c0 = arith.constant 0 : index
    %c0_0 = arith.constant 0 : index
    %c0_1 = arith.constant 0 : index
    %0 = vector.load %arg1[%c0, %c0_0, %c0_1] : memref<16x16x256xf32, #tpu.memory_space<vmem>>, vector<16x16x256xf32>
    %1 = vector.shape_cast %0 : vector<16x16x256xf32> to vector<256x256xf32>
    %c0_2 = arith.constant 0 : index
    %c0_3 = arith.constant 0 : index
    %2 = vector.load %arg2[%c0_2, %c0_3] : memref<256x128xf32, #tpu.memory_space<vmem>>, vector<256x128xf32>
    %cst = arith.constant dense<0.000000e+00> : vector<256x128xf32>
    %3 = tpu.matmul %1, %2, %cst {dimension_numbers = #tpu.dot_dimension_numbers<[1], [0], [0], [1], [0, 0, 1, 1], [], []>} : vector<256x256xf32>, vector<256x128xf32>, vector<256x128xf32> -> vector<256x128xf32>
    %cst_4 = arith.constant 0.000000e+00 : f32
    %4 = vector.broadcast %cst_4 : f32 to vector<256x128xf32>
    %5 = arith.maximumf %3, %4 : vector<256x128xf32>
    %c0_5 = arith.constant 0 : index
    %c0_6 = arith.constant 0 : index
    %6 = vector.load %arg3[%c0_5, %c0_6] : memref<1x128xf32, #tpu.memory_space<vmem>>, vector<1x128xf32>
    %7 = vector.shape_cast %5 : vector<256x128xf32> to vector<16x16x128xf32>
    %8 = vector.shape_cast %6 : vector<1x128xf32> to vector<1x1x128xf32>
    %9 = vector.broadcast %8 : vector<1x1x128xf32> to vector<16x16x128xf32>
    %10 = arith.mulf %7, %9 : vector<16x16x128xf32>
    %cst_7 = arith.constant dense<0.000000e+00> : vector<16x16xf32>
    %11 = vector.multi_reduction <add>, %10, %cst_7 [2] : vector<16x16x128xf32> to vector<16x16xf32>
    %cst_8 = arith.constant dense<0xFF800000> : vector<16xf32>
    %12 = vector.multi_reduction <maximumf>, %11, %cst_8 [1] : vector<16x16xf32> to vector<16xf32>
    %13 = vector.shape_cast %12 : vector<16xf32> to vector<16x1xf32>
    %14 = vector.broadcast %13 : vector<16x1xf32> to vector<16x16xf32>
    %15 = arith.subf %11, %14 : vector<16x16xf32>
    %16 = math.exp %15 : vector<16x16xf32>
    %cst_9 = arith.constant dense<0.000000e+00> : vector<16xf32>
    %17 = vector.multi_reduction <add>, %16, %cst_9 [1] : vector<16x16xf32> to vector<16xf32>
    %18 = vector.shape_cast %17 : vector<16xf32> to vector<16x1xf32>
    %19 = tpu.reciprocal %18 {approx = true} : vector<16x1xf32> -> vector<16x1xf32>
    %20 = vector.broadcast %19 : vector<16x1xf32> to vector<16x16xf32>
    %21 = arith.mulf %16, %20 : vector<16x16xf32>
    %cst_10 = arith.constant 0.000000e+00 : f32
    %22 = vector.broadcast %cst_10 : f32 to vector<16x256xf32>
    %23 = vector.extract_strided_slice %0 {offsets = [0, 0, 0], sizes = [16, 8, 256], strides = [1, 1, 1]} : vector<16x16x256xf32> to vector<16x8x256xf32>
    %24 = vector.extract_strided_slice %21 {offsets = [0, 0], sizes = [16, 8], strides = [1, 1]} : vector<16x16xf32> to vector<16x8xf32>
    %25 = vector.shape_cast %24 : vector<16x8xf32> to vector<16x8x1xf32>
    %26 = vector.broadcast %25 : vector<16x8x1xf32> to vector<16x8x256xf32>
    %27 = arith.mulf %26, %23 : vector<16x8x256xf32>
    %cst_11 = arith.constant dense<0.000000e+00> : vector<16x256xf32>
    %28 = vector.multi_reduction <add>, %27, %cst_11 [1] : vector<16x8x256xf32> to vector<16x256xf32>
    %29 = arith.addf %22, %28 : vector<16x256xf32>
    %30 = vector.extract_strided_slice %0 {offsets = [0, 8, 0], sizes = [16, 8, 256], strides = [1, 1, 1]} : vector<16x16x256xf32> to vector<16x8x256xf32>
    %31 = vector.extract_strided_slice %21 {offsets = [0, 8], sizes = [16, 8], strides = [1, 1]} : vector<16x16xf32> to vector<16x8xf32>
    %32 = vector.shape_cast %31 : vector<16x8xf32> to vector<16x8x1xf32>
    %33 = vector.broadcast %32 : vector<16x8x1xf32> to vector<16x8x256xf32>
    %34 = arith.mulf %33, %30 : vector<16x8x256xf32>
    %cst_12 = arith.constant dense<0.000000e+00> : vector<16x256xf32>
    %35 = vector.multi_reduction <add>, %34, %cst_12 [1] : vector<16x8x256xf32> to vector<16x256xf32>
    %36 = arith.addf %29, %35 : vector<16x256xf32>
    %c0_13 = arith.constant 0 : index
    %c0_14 = arith.constant 0 : index
    %37 = vector.load %arg4[%c0_13, %c0_14] : memref<16x256xf32, #tpu.memory_space<vmem>>, vector<16x256xf32>
    tpu.vector_store %arg4[%c0_13, %c0_14], %36 {strides = array<i32>} : memref<16x256xf32, #tpu.memory_space<vmem>>, vector<16x256xf32>,
    %c0_15 = arith.constant 0 : index
    %c0_16 = arith.constant 0 : index
    %38 = vector.load %arg5[%c0_15, %c0_16] : memref<16x16xf32, #tpu.memory_space<vmem>>, vector<16x16xf32>
    tpu.vector_store %arg5[%c0_15, %c0_16], %21 {strides = array<i32>} : memref<16x16xf32, #tpu.memory_space<vmem>>, vector<16x16xf32>,
    return
  }
  func.func @transform_0(%arg0: i32) -> (i32, i32, i32) {
    %c0_i32 = arith.constant 0 : i32
    %c0_i32_0 = arith.constant 0 : i32
    %c0_i32_1 = arith.constant 0 : i32
    return %arg0, %c0_i32, %c0_i32_0 : i32, i32, i32
  }
  func.func @transform_1(%arg0: i32) -> (i32, i32) {
    %c0_i32 = arith.constant 0 : i32
    %c0_i32_0 = arith.constant 0 : i32
    %c0_i32_1 = arith.constant 0 : i32
    return %c0_i32, %c0_i32_0 : i32, i32
  }
  func.func @transform_2(%arg0: i32) -> (i32, i32) {
    %c0_i32 = arith.constant 0 : i32
    %c0_i32_0 = arith.constant 0 : i32
    %c0_i32_1 = arith.constant 0 : i32
    return %c0_i32, %c0_i32_0 : i32, i32
  }
  func.func @transform_3(%arg0: i32) -> (i32, i32) {
    %c0_i32 = arith.constant 0 : i32
    %c0_i32_0 = arith.constant 0 : i32
    return %arg0, %c0_i32 : i32, i32
  }
  func.func @transform_4(%arg0: i32) -> (i32, i32) {
    %c0_i32 = arith.constant 0 : i32
    %c0_i32_0 = arith.constant 0 : i32
    return %arg0, %c0_i32 : i32, i32
  }
}

</mosaic_0001>

<bundles_post_ra>
// kernel: dattention_forward.1
= control target key start
LH: loop header
LB: loop body
LE: loop exit
PB: predicated region body
PF: predicated region fallthrough
CT: control target
= control target key end

     0   :  { %10 = vsyncpa [#allocation3], 0  ;;  %s3733_s0 = inlined_call_operand.hbm [shape: f32[32,16,256], index: 0, kind: input, shape index: {}]   ;;  %s3734_s1 = inlined_call_operand.hbm [shape: f32[256,128], index: 1, kind: input, shape index: {}]   ;;  %s3735_s2 = inlined_call_operand.vmem [shape: f32[1,128], index: 2, kind: input, shape index: {}]   ;;  %s3736_s3 = inlined_call_operand.hbm [shape: f32[32,256], index: 3, kind: output, shape index: {0}]   ;;  %s3737_s4 = inlined_call_operand.vmem [shape: f32[32,16], index: 4, kind: output, shape index: {1}]  }
   0x1   :  { %12 = vsyncpa [#allocation3 + $0x1], 0 }
   0x2   :  { %13 = vsyncpa [#allocation6], 0 }
   0x3   :  { %14 = vsyncpa [#allocation4], 0 }
   0x4   :  { %16 = vsyncpa [#allocation4 + $0x1], 0  ;;  %s2577_s15 = smov 0   ;;  %s2579_s16 = smov 0  }
   0x5   :  { %s2581_s17 = smov 0   ;;  %s2583_s18 = smov 0  }
   0x6 LB: > { %s2598_s19 = sadd.s32 4294967295, %s2542_s18   ;;  %s2156_s20 = sadd.s32 4294967294, %s2542_s18   ;;  %s2542_s18 = sphi %s2583_s18, %s3754_s18   ;;  %s2538_s17 = sphi %s2581_s17, %s3753_s17   ;;  %s2534_s16 = sphi %s2579_s16, %s3752_s16   ;;  %s2530_s15 = sphi %s2577_s15, %s3751_s15  }
   0x7   : > { %p42_p0 = scmp.ne.s32.totalorder %s2534_s16, %s2530_s15  ;;  %p43_p1 = scmp.eq.s32.totalorder %s2598_s19, 0 }
   0x8   : > { %p108_p2 = scmp.eq.s32.totalorder %s2598_s19, 1  ;;  %p114_p3 = scmp.eq.s32.totalorder %s2156_s20, 1 }
   0x9   : > { %p2607_p4 = por %p43_p1, %p42_p0  ;;  %p2157_p5 = scmp.ge.s32.totalorder %s2542_s18, 1 }
   0xa   : > { %p2612_p6 = por %p114_p3, %p42_p0  ;;  %p147_p7 = scmp.lt.s32.totalorder %s2542_s18, 3 }
   0xb   : > { %s158_s25 = sshll.u32 %s3734_s1, 4  ;;  %s2544_s27 = smov [#allocation5]   ;;  %s159_s25 = int_to_ptr.hbm [resolvable:$true] %s158_s25 }
   0xc   : > { %p2620_p8 = pnand %p2157_p5, %p147_p7  ;;  %s160_s28 = sshll.u32 %s2544_s27, 4  ;;  %s161_s28 = int_to_ptr.vmem [resolvable:$true] %s160_s28 }
   0xd   : > { %s2630_s29 = sadd.s32 1, %s2542_s18   ;;  %s2545_s30 = smov 128  }
   0xe   : > { %p2220_p9 = pneg %p2620_p8  ;;  %s2546_s5 = smov 8  }
   0xf   : > { %s26_s6 = ssub.s32 %s2542_s18, %s2630_s29  ;;  %s29_s7 = sadd.s32 1, %s2538_s17 }
  0x10   : > { %p2221_p10 = pnand %p2220_p9, %p43_p1  ;;  %p27_p12 = scmp.eq.s32.totalorder %s26_s6, 0 }
  0x11   : > { %p36_p13 = scmp.ne.s32.totalorder %s2538_s17, %s2534_s16  ;;  %p37_p0 = scmp.eq.s32.totalorder %s2542_s18, 0 }
  0x12   : > { %2223 = dma.hbm_to_vmem [thread:$0]  (!%p2221_p10), %s159_s25, 4096, %s161_s28, [#allocation6], %s2545_s30, %s2545_s30, %s2546_s5  }
  0x13   : > { %p2233_p3 = scmp.lt.s32.totalorder %s2542_s18, 2  ;;  %p38_p5 = por %p37_p0, %p36_p13 }
  0x14   : > { %s2640_s8 = scalar_select %p27_p12, %s2538_s17, %s29_s7  }
  0x15   : > { %p2644_p7 = por %p108_p2, %p36_p13  ;;  %s177_s10 = sand.u32 1, %s2538_s17  }
  0x16   : > { %s2177_s11 = sshll.u32 %s2542_s18, 9  ;;  %s2160_s12 = sshll.u32 %s177_s10, 9 }
  0x17   : > { %s187_s20 = scalar_lea.hbm %s3733_s0, %s2177_s11  ;;  %s181_s24 = scalar_lea.vmem [#allocation2], %s2160_s12 }
  0x18   : > { %s188_s23 = sshll.u32 %s187_s20, 4  ;;  %s190_s25 = sshll.u32 %s181_s24, 4  ;;  %s189_s23 = int_to_ptr.hbm [resolvable:$true] %s188_s23  ;;  %s191_s25 = int_to_ptr.vmem [resolvable:$true] %s190_s25 }
  0x19   : > { %p2655_p9 = pnand %p2233_p3, %p38_p5  ;;  %s178_s28 = scalar_lea.sflag [#allocation3], %s177_s10 }
  0x1a   : > { %s2442_s30 = sshra.s32 %s189_s23, 4  ;;  %s2449_s11 = scalar_lea.hbm %s3733_s0, 1024  ;;  %s2443_s30 = int_to_ptr.hbm [resolvable:$true] %s2442_s30 }
  0x1b   : > { %s2444_s5 = scalar_lea.hbm %s2443_s30, 512  ;;  %p2446_p10 = pneg %p2655_p9 }
  0x1c   : > { %p2445_p2 = scmp.ne.s32.totalorder %s2443_s30, %s2444_s5  ;;  %p2450_p0 = scmp.lt.s32.totalorder %s2443_s30, %s3733_s0 }
  0x1d   : > { %p2451_p3 = scmp.lt.s32.totalorder %s2449_s11, %s2444_s5 }
  0x1e   : > { %p2447_p12 = pnand %p2446_p10, %p2445_p2 }
  0x1f   : > { %p2452_p5 = por %p2451_p3, %p2450_p0 }
  0x20   : > { %p2448_p13 = pneg %p2447_p12 }
  0x22   : > { %p2453_p11 = pnand %p2452_p5, %p2448_p13 }
  0x24   : > { %2456 = shalt.err (!%p2453_p11)
}
  0x25   : > { %s2547_s10 = smov 256   ;;  %s2548_s14 = smov 16  }
  0x26   : > { %2227 = dma.hbm_to_vmem [thread:$0]  (!%p2655_p9), %s189_s23, 8192, %s191_s25, %s178_s28, %s2547_s10, %s2547_s10, %s2548_s14  }
  0x27   : > { %202 = sbr.rel (%p2620_p8) target bundleno = 1135 (0x46f), region = 32  ;;  %s2672_s20 = sand.u32 (!%p2620_p8), 1, %s2534_s16  }
  0x28   : > { %s2165_s24 = sshll.u32 (!%p2620_p8), %s2672_s20, 9  ;;  %s205_s30 = scalar_lea.sflag (!%p2620_p8), [#allocation3], %s2672_s20 }
  0x29   : > { %s2676_s5 = scalar_lea.vmem (!%p2620_p8), [#allocation2], %s2165_s24 }
  0x2c   : > { %2517 = dma.done.wait (%p2607_p4), %s205_s30, 8192  }
  0x2d   : > { %2519 = vsyncadd (%p2607_p4), %s205_s30, 4294959104 }
  0x2e   : > { %2521 = dma.done.wait (%p43_p1), [#allocation6], 4096  }
  0x2f   : > { %2523 = vsyncadd (%p43_p1), [#allocation6], 4294963200  ;;  %v331_v0 = vld [vmem:[#allocation5 + $0x78] sm:$0xff]  ;;  %v330_v2 = vld [vmem:[#allocation5 + $0x70] sm:$0xff]  ;;  %vm743_vm0 = vcmask 130112   ;;  %vm790_vm1 = vcmask 1041409  }
  0x30   : > { %v347_v1 = vld [vmem:[#allocation5 + $0xf8] sm:$0xff]  ;;  %348 = vmatpush.msra.mxu0 %v331_v0  ;;  %2180 = vmatpush.msra.mxu2 %v331_v0  ;;  %v346_v3 = vld [vmem:[#allocation5 + $0xf0] sm:$0xff]  ;;  %v329_v4 = vld [vmem:[#allocation5 + $0x68] sm:$0xff]  ;;  %vm792_vm2 = vcmask 1042434   ;;  %vm794_vm3 = vcmask 1043459   ;;  %vm796_vm4 = vcmask 1044484  }
  0x31   : > { %461 = vmatpush.msra.mxu1 %v347_v1  ;;  %2196 = vmatpush.msra.mxu3 %v347_v1  ;;  %v345_v5 = vld [vmem:[#allocation5 + $0xe8] sm:$0xff]  ;;  %v328_v6 = vld [vmem:[#allocation5 + $0x60] sm:$0xff]  ;;  %v327_v8 = vld [vmem:[#allocation5 + $0x58] sm:$0xff]  ;;  %vm798_vm5 = vcmask 1045509   ;;  %vm800_vm6 = vcmask 1046534   ;;  %vm802_vm7 = vcmask 1047559  }
  0x32   : > { %349 = vmatpush.msra.mxu0 %v330_v2  ;;  %2181 = vmatpush.msra.mxu2 %v330_v2  ;;  %v344_v7 = vld [vmem:[#allocation5 + $0xe0] sm:$0xff]  ;;  %v343_v9 = vld [vmem:[#allocation5 + $0xd8] sm:$0xff]  ;;  %v326_v10 = vld [vmem:[#allocation5 + $0x50] sm:$0xff]  ;;  %vm813_vm8 = vcmask 130048   ;;  %s2168_s23 = sshll.u32 %s2598_s19, 1  ;;  %s2167_s28 = sshll.u32 %s2672_s20, 5 }
  0x33   : > { %462 = vmatpush.msra.mxu1 %v346_v3  ;;  %2197 = vmatpush.msra.mxu3 %v346_v3  ;;  %v342_v11 = vld [vmem:[#allocation5 + $0xd0] sm:$0xff]  ;;  %v325_v12 = vld [vmem:[#allocation5 + $0x48] sm:$0xff]  ;;  %v324_v14 = vld [vmem:[#allocation5 + $0x40] sm:$0xff]  ;;  %p3618_p1 = scmp.lt.s32.totalorder %s2168_s23, 3  ;;  %s2179_s12 = sshll.u32 %s2598_s19, 5 }
  0x34   : > { %350 = vmatpush.msra.mxu0 %v329_v4  ;;  %2182 = vmatpush.msra.mxu2 %v329_v4  ;;  %v341_v13 = vld [vmem:[#allocation5 + $0xc8] sm:$0xff]  ;;  %v340_v15 = vld [vmem:[#allocation5 + $0xc0] sm:$0xff]  ;;  %v323_v16 = vld [vmem:[#allocation5 + $0x38] sm:$0xff]  ;;  %s2040_s10 = scalar_lea.hbm %s3736_s3, %s2179_s12  ;;  %s236_s14 = scalar_lea.vmem [#allocation7], %s2167_s28 }
  0x35   : > { %463 = vmatpush.msra.mxu1 %v345_v5  ;;  %2198 = vmatpush.msra.mxu3 %v345_v5  ;;  %v339_v17 = vld [vmem:[#allocation5 + $0xb8] sm:$0xff]  ;;  %v322_v18 = vld [vmem:[#allocation5 + $0x30] sm:$0xff]  ;;  %v321_v20 = vld [vmem:[#allocation5 + $0x28] sm:$0xff]  ;;  %s3756_s23 = smov (!%p3618_p1, %s2168_s23), 3  ;;  %s2041_s24 = sshll.u32 %s236_s14, 4  ;;  %s2042_s24 = int_to_ptr.vmem [resolvable:$true] %s2041_s24 }
  0x36   : > { %351 = vmatpush.msra.mxu0 %v328_v6  ;;  %2183 = vmatpush.msra.mxu2 %v328_v6  ;;  %v338_v19 = vld [vmem:[#allocation5 + $0xb0] sm:$0xff]  ;;  %v337_v21 = vld [vmem:[#allocation5 + $0xa8] sm:$0xff]  ;;  %v320_v22 = vld [vmem:[#allocation5 + $0x20] sm:$0xff]  ;;  %s2169_s27 = sshll.u32 %s3756_s23, 3  ;;  %s2043_s30 = sshll.u32 %s2040_s10, 4  ;;  %s2044_s30 = int_to_ptr.hbm [resolvable:$true] %s2043_s30 }
  0x37   : > { %464 = vmatpush.msra.mxu1 %v344_v7  ;;  %2199 = vmatpush.msra.mxu3 %v344_v7  ;;  %v336_v23 = vld [vmem:[#allocation5 + $0xa0] sm:$0xff]  ;;  %v319_v24 = vld [vmem:[#allocation5 + $0x18] sm:$0xff]  ;;  %v318_v26 = vld [vmem:[#allocation5 + $0x10] sm:$0xff]  ;;  %s250_s11 = scalar_lea.vmem %s3737_s4, %s2169_s27  ;;  %s2486_s21 = sshra.s32 %s2044_s30, 4  ;;  %s2487_s21 = int_to_ptr.hbm [resolvable:$true] %s2486_s21 }
  0x38   : > { %352 = vmatpush.msra.mxu0 %v327_v8  ;;  %2184 = vmatpush.msra.mxu2 %v327_v8  ;;  %v335_v25 = vld [vmem:[#allocation5 + $0x98] sm:$0xff]  ;;  %v334_v27 = vld [vmem:[#allocation5 + $0x90] sm:$0xff]  ;;  %v317_v28 = vld [vmem:[#allocation5 + $0x8] sm:$0xff]  ;;  %s2488_s26 = scalar_lea.hbm %s2487_s21, 32  ;;  %s2492_s27 = scalar_lea.hbm %s3736_s3, 64 }
  0x39   : > { %465 = vmatpush.msra.mxu1 %v343_v9  ;;  %2200 = vmatpush.msra.mxu3 %v343_v9  ;;  %v333_v29 = vld [vmem:[#allocation5 + $0x88] sm:$0xff]  ;;  %v316_v30 = vld [vmem:[#allocation5] sm:$0xff]  ;;  %v254_v36 = vld [vmem:[%s2676_s5 + $0x10] sm:$0xff]  ;;  %p2489_p4 = scmp.ne.s32.totalorder %s2487_s21, %s2488_s26  ;;  %p2493_p9 = scmp.lt.s32.totalorder %s2487_s21, %s3736_s3 }
  0x3a   : > { %353 = vmatpush.msra.mxu0 %v326_v10  ;;  %2185 = vmatpush.msra.mxu2 %v326_v10  ;;  %v332_v31 = vld [vmem:[#allocation5 + $0x80] sm:$0xff]  ;;  %v253_v34 = vld [vmem:[%s2676_s5 + $0x8] sm:$0xff]  ;;  %v286_v37 = vld [vmem:[%s2676_s5 + $0x110] sm:$0xff]  ;;  %p2494_p2 = scmp.lt.s32.totalorder %s2492_s27, %s2488_s26 }
  0x3b   : > { %466 = vmatpush.msra.mxu1 %v342_v11  ;;  %2201 = vmatpush.msra.mxu3 %v342_v11  ;;  %v252_v32 = vld [vmem:[%s2676_s5] sm:$0xff]  ;;  %v285_v35 = vld [vmem:[%s2676_s5 + $0x108] sm:$0xff]  ;;  %v255_v38 = vld [vmem:[%s2676_s5 + $0x18] sm:$0xff]  ;;  %p2490_p8 = pnand %p2489_p4, %p2644_p7 }
  0x3c   : > { %354 = vmatpush.msra.mxu0 %v325_v12  ;;  %2186 = vmatpush.msra.mxu2 %v325_v12  ;;  %v284_v33 = vld [vmem:[%s2676_s5 + $0x100] sm:$0xff]  ;;  %v287_v39 = vld [vmem:[%s2676_s5 + $0x118] sm:$0xff]  ;;  %v257_v42 = vld [vmem:[%s2676_s5 + $0x28] sm:$0xff]  ;;  %p2495_p10 = por %p2494_p2, %p2493_p9 }
  0x3d   : > { %467 = vmatpush.msra.mxu1 %v341_v13  ;;  %2202 = vmatpush.msra.mxu3 %v341_v13  ;;  %v256_v40 = vld [vmem:[%s2676_s5 + $0x20] sm:$0xff]  ;;  %v289_v43 = vld [vmem:[%s2676_s5 + $0x128] sm:$0xff]  ;;  %v258_v44 = vld [vmem:[%s2676_s5 + $0x30] sm:$0xff]  ;;  %p2491_p11 = pneg %p2490_p8 }
  0x3e   : > { %355 = vmatpush.msra.mxu0 %v324_v14  ;;  %2187 = vmatpush.msra.mxu2 %v324_v14  ;;  %v288_v41 = vld [vmem:[%s2676_s5 + $0x120] sm:$0xff]  ;;  %v290_v45 = vld [vmem:[%s2676_s5 + $0x130] sm:$0xff]  ;;  %v259_v46 = vld [vmem:[%s2676_s5 + $0x38] sm:$0xff] }
  0x3f   : > { %468 = vmatpush.msra.mxu1 %v340_v15  ;;  %2203 = vmatpush.msra.mxu3 %v340_v15  ;;  %v291_v47 = vld [vmem:[%s2676_s5 + $0x138] sm:$0xff]  ;;  %v260_v48 = vld [vmem:[%s2676_s5 + $0x40] sm:$0xff]  ;;  %v261_v50 = vld [vmem:[%s2676_s5 + $0x48] sm:$0xff]  ;;  %p2496_p12 = pnand %p2495_p10, %p2491_p11 }
  0x40   : > { %356 = vmatpush.msra.mxu0 %v323_v16  ;;  %2188 = vmatpush.msra.mxu2 %v323_v16  ;;  %v292_v49 = vld [vmem:[%s2676_s5 + $0x140] sm:$0xff]  ;;  %v293_v51 = vld [vmem:[%s2676_s5 + $0x148] sm:$0xff]  ;;  %v294_v52 = vld [vmem:[%s2676_s5 + $0x150] sm:$0xff] }
  0x41   : > { %469 = vmatpush.msra.mxu1 %v339_v17  ;;  %2204 = vmatpush.msra.mxu3 %v339_v17  ;;  %v262_v53 = vld [vmem:[%s2676_s5 + $0x50] sm:$0xff]  ;;  %v295_v54 = vld [vmem:[%s2676_s5 + $0x158] sm:$0xff]  ;;  %v296_v56 = vld [vmem:[%s2676_s5 + $0x160] sm:$0xff] }
  0x42   : > { %357 = vmatpush.msra.mxu0 %v322_v18  ;;  %2189 = vmatpush.msra.mxu2 %v322_v18  ;;  %v263_v55 = vld [vmem:[%s2676_s5 + $0x58] sm:$0xff]  ;;  %v264_v57 = vld [vmem:[%s2676_s5 + $0x60] sm:$0xff]  ;;  %v297_v58 = vld [vmem:[%s2676_s5 + $0x168] sm:$0xff] }
  0x43   : > { %470 = vmatpush.msra.mxu1 %v338_v19  ;;  %2205 = vmatpush.msra.mxu3 %v338_v19  ;;  %v265_v59 = vld [vmem:[%s2676_s5 + $0x68] sm:$0xff]  ;;  %v298_v60 = vld [vmem:[%s2676_s5 + $0x170] sm:$0xff]  ;;  %v299_v62 = vld [vmem:[%s2676_s5 + $0x178] sm:$0xff] }
  0x44   : > { %358 = vmatpush.msra.mxu0 %v321_v20  ;;  %2190 = vmatpush.msra.mxu2 %v321_v20  ;;  %v266_v61 = vld [vmem:[%s2676_s5 + $0x70] sm:$0xff]  ;;  %v267_v63 = vld [vmem:[%s2676_s5 + $0x78] sm:$0xff]  ;;  %v300_v0 = vld [vmem:[%s2676_s5 + $0x180] sm:$0xff] }
  0x45   : > { %471 = vmatpush.msra.mxu1 %v337_v21  ;;  %2206 = vmatpush.msra.mxu3 %v337_v21  ;;  %v268_v1 = vld [vmem:[%s2676_s5 + $0x80] sm:$0xff]  ;;  %v301_v2 = vld [vmem:[%s2676_s5 + $0x188] sm:$0xff]  ;;  %v302_v4 = vld [vmem:[%s2676_s5 + $0x190] sm:$0xff] }
  0x46   : > { %359 = vmatpush.msra.mxu0 %v320_v22  ;;  %2191 = vmatpush.msra.mxu2 %v320_v22  ;;  %v269_v3 = vld [vmem:[%s2676_s5 + $0x88] sm:$0xff]  ;;  %v270_v5 = vld [vmem:[%s2676_s5 + $0x90] sm:$0xff]  ;;  %v303_v6 = vld [vmem:[%s2676_s5 + $0x198] sm:$0xff] }
  0x47   : > { %472 = vmatpush.msra.mxu1 %v336_v23  ;;  %2207 = vmatpush.msra.mxu3 %v336_v23  ;;  %v271_v7 = vld [vmem:[%s2676_s5 + $0x98] sm:$0xff]  ;;  %v304_v8 = vld [vmem:[%s2676_s5 + $0x1a0] sm:$0xff]  ;;  %v305_v10 = vld [vmem:[%s2676_s5 + $0x1a8] sm:$0xff] }
  0x48   : > { %360 = vmatpush.msra.mxu0 %v319_v24  ;;  %2192 = vmatpush.msra.mxu2 %v319_v24  ;;  %v272_v9 = vld [vmem:[%s2676_s5 + $0xa0] sm:$0xff]  ;;  %v273_v11 = vld [vmem:[%s2676_s5 + $0xa8] sm:$0xff]  ;;  %v306_v12 = vld [vmem:[%s2676_s5 + $0x1b0] sm:$0xff] }
  0x49   : > { %473 = vmatpush.msra.mxu1 %v335_v25  ;;  %2208 = vmatpush.msra.mxu3 %v335_v25  ;;  %v274_v13 = vld [vmem:[%s2676_s5 + $0xb0] sm:$0xff]  ;;  %v307_v14 = vld [vmem:[%s2676_s5 + $0x1b8] sm:$0xff]  ;;  %v308_v16 = vld [vmem:[%s2676_s5 + $0x1c0] sm:$0xff] }
  0x4a   : > { %361 = vmatpush.msra.mxu0 %v318_v26  ;;  %2193 = vmatpush.msra.mxu2 %v318_v26  ;;  %v275_v15 = vld [vmem:[%s2676_s5 + $0xb8] sm:$0xff]  ;;  %v276_v17 = vld [vmem:[%s2676_s5 + $0xc0] sm:$0xff]  ;;  %v309_v18 = vld [vmem:[%s2676_s5 + $0x1c8] sm:$0xff] }
  0x4b   : > { %474 = vmatpush.msra.mxu1 %v334_v27  ;;  %2209 = vmatpush.msra.mxu3 %v334_v27  ;;  %v277_v19 = vld [vmem:[%s2676_s5 + $0xc8] sm:$0xff]  ;;  %v310_v20 = vld [vmem:[%s2676_s5 + $0x1d0] sm:$0xff]  ;;  %v311_v22 = vld [vmem:[%s2676_s5 + $0x1d8] sm:$0xff] }
  0x4c   : > { %362 = vmatpush.msra.mxu0 %v317_v28  ;;  %2194 = vmatpush.msra.mxu2 %v317_v28  ;;  %v278_v21 = vld [vmem:[%s2676_s5 + $0xd0] sm:$0xff]  ;;  %v279_v23 = vld [vmem:[%s2676_s5 + $0xd8] sm:$0xff]  ;;  %v312_v24 = vld [vmem:[%s2676_s5 + $0x1e0] sm:$0xff] }
  0x4d   : > { %475 = vmatpush.msra.mxu1 %v333_v29  ;;  %2210 = vmatpush.msra.mxu3 %v333_v29  ;;  %v280_v25 = vld [vmem:[%s2676_s5 + $0xe0] sm:$0xff]  ;;  %v313_v26 = vld [vmem:[%s2676_s5 + $0x1e8] sm:$0xff]  ;;  %v314_v28 = vld [vmem:[%s2676_s5 + $0x1f0] sm:$0xff] }
  0x4e   : > { %363 = vmatpush.msra.mxu0 %v316_v30  ;;  %2195 = vmatpush.msra.mxu2 %v316_v30  ;;  %v281_v27 = vld [vmem:[%s2676_s5 + $0xe8] sm:$0xff]  ;;  %v282_v29 = vld [vmem:[%s2676_s5 + $0xf0] sm:$0xff]  ;;  %v315_v30 = vld [vmem:[%s2676_s5 + $0x1f8] sm:$0xff] }
  0x4f   : > { %476 = vmatpush.msra.mxu1 %v332_v31  ;;  %2211 = vmatpush.msra.mxu3 %v332_v31  ;;  %v283_v31 = vld [vmem:[%s2676_s5 + $0xf8] sm:$0xff] }
  0x50   : > { %364 = vmatmul.f32.vlgmr.msra.gmra.mxu0 %v252_v32  ;;  %412 = vmatmul.f32.vlgmr.msra.gmra.mxu2 %v284_v33 }
  0x51   : > { %477 = vmatmul.f32.vlgmr.msra.gmra.mxu1 %v253_v34  ;;  %525 = vmatmul.f32.vlgmr.msra.gmra.mxu3 %v285_v35  ;;  %v2753_v35 = vld [vmem:[%s3735_s2] ss:$0 sm:$0xff] }
  0x58   : > { %367 = vmatmul.f32.gmra.mxu0 %v254_v36  ;;  %415 = vmatmul.f32.gmra.mxu2 %v286_v37 }
  0x59   : > { %480 = vmatmul.f32.gmra.mxu1 %v255_v38  ;;  %528 = vmatmul.f32.gmra.mxu3 %v287_v39 }
  0x60   : > { %370 = vmatmul.f32.gmra.mxu0 %v256_v40  ;;  %418 = vmatmul.f32.gmra.mxu2 %v288_v41 }
  0x61   : > { %483 = vmatmul.f32.gmra.mxu1 %v257_v42  ;;  %531 = vmatmul.f32.gmra.mxu3 %v289_v43 }
  0x68   : > { %373 = vmatmul.f32.gmra.mxu0 %v258_v44  ;;  %421 = vmatmul.f32.gmra.mxu2 %v290_v45 }
  0x69   : > { %486 = vmatmul.f32.gmra.mxu1 %v259_v46  ;;  %534 = vmatmul.f32.gmra.mxu3 %v291_v47 }
  0x70   : > { %376 = vmatmul.f32.gmra.mxu0 %v260_v48  ;;  %424 = vmatmul.f32.gmra.mxu2 %v292_v49 }
  0x71   : > { %489 = vmatmul.f32.gmra.mxu1 %v261_v50  ;;  %537 = vmatmul.f32.gmra.mxu3 %v293_v51 }
  0x78   : > { %427 = vmatmul.f32.gmra.mxu2 %v294_v52  ;;  %379 = vmatmul.f32.gmra.mxu0 %v262_v53 }
  0x79   : > { %540 = vmatmul.f32.gmra.mxu3 %v295_v54  ;;  %492 = vmatmul.f32.gmra.mxu1 %v263_v55 }
  0x80   : > { %430 = vmatmul.f32.gmra.mxu2 %v296_v56  ;;  %382 = vmatmul.f32.gmra.mxu0 %v264_v57 }
  0x81   : > { %543 = vmatmul.f32.gmra.mxu3 %v297_v58  ;;  %495 = vmatmul.f32.gmra.mxu1 %v265_v59 }
  0x88   : > { %433 = vmatmul.f32.gmra.mxu2 %v298_v60  ;;  %385 = vmatmul.f32.gmra.mxu0 %v266_v61 }
  0x89   : > { %546 = vmatmul.f32.gmra.mxu3 %v299_v62  ;;  %498 = vmatmul.f32.gmra.mxu1 %v267_v63 }
  0x90   : > { %436 = vmatmul.f32.gmra.mxu2 %v300_v0  ;;  %388 = vmatmul.f32.gmra.mxu0 %v268_v1 }
  0x91   : > { %549 = vmatmul.f32.gmra.mxu3 %v301_v2  ;;  %501 = vmatmul.f32.gmra.mxu1 %v269_v3 }
  0x98   : > { %439 = vmatmul.f32.gmra.mxu2 %v302_v4  ;;  %391 = vmatmul.f32.gmra.mxu0 %v270_v5 }
  0x99   : > { %552 = vmatmul.f32.gmra.mxu3 %v303_v6  ;;  %504 = vmatmul.f32.gmra.mxu1 %v271_v7 }
  0xa0   : > { %442 = vmatmul.f32.gmra.mxu2 %v304_v8  ;;  %394 = vmatmul.f32.gmra.mxu0 %v272_v9 }
  0xa1   : > { %555 = vmatmul.f32.gmra.mxu3 %v305_v10  ;;  %507 = vmatmul.f32.gmra.mxu1 %v273_v11 }
  0xa8   : > { %445 = vmatmul.f32.gmra.mxu2 %v306_v12  ;;  %397 = vmatmul.f32.gmra.mxu0 %v274_v13 }
  0xa9   : > { %558 = vmatmul.f32.gmra.mxu3 %v307_v14  ;;  %510 = vmatmul.f32.gmra.mxu1 %v275_v15 }
  0xb0   : > { %448 = vmatmul.f32.gmra.mxu2 %v308_v16  ;;  %400 = vmatmul.f32.gmra.mxu0 %v276_v17 }
  0xb1   : > { %561 = vmatmul.f32.gmra.mxu3 %v309_v18  ;;  %513 = vmatmul.f32.gmra.mxu1 %v277_v19 }
  0xb8   : > { %451 = vmatmul.f32.gmra.mxu2 %v310_v20  ;;  %403 = vmatmul.f32.gmra.mxu0 %v278_v21 }
  0xb9   : > { %564 = vmatmul.f32.gmra.mxu3 %v311_v22  ;;  %516 = vmatmul.f32.gmra.mxu1 %v279_v23 }
  0xc0   : > { %454 = vmatmul.f32.gmra.mxu2 %v312_v24  ;;  %406 = vmatmul.f32.gmra.mxu0 %v280_v25 }
  0xc1   : > { %567 = vmatmul.f32.gmra.mxu3 %v313_v26  ;;  %519 = vmatmul.f32.gmra.mxu1 %v281_v27 }
  0xc8   : > { %457 = vmatmul.f32.gmra.mxu2 %v314_v28  ;;  %409 = vmatmul.f32.gmra.mxu0 %v282_v29 }
  0xc9   : > { %570 = vmatmul.f32.gmra.mxu3 %v315_v30  ;;  %522 = vmatmul.f32.gmra.mxu1 %v283_v31 }
  0xcd   : > { %v365_v32 = vpop.f32.mrf.mxu0 }
  0xce   : > { %v478_v33 = vpop.f32.mrf.mxu1 }
  0xcf   : > { %v479_v34 = vadd.f32 %v478_v33, %v365_v32 }
  0xd1   : > { %v574_v36 = vmax.f32 %v479_v34, 0.0 }
  0xd3   : > { %v413_v37 = vpop.f32.mrf.mxu2  ;;  %v610_v38 = vmul.f32 %v2753_v35, %v574_v36 }
  0xd4   : > { %v526_v39 = vpop.f32.mrf.mxu3 }
  0xd5   : > { %v527_v40 = vadd.f32 %v526_v39, %v413_v37  ;;  %642 = vadd.xlane.f32.xlu0 %v610_v38  ;;  %v368_v41 = vpop.f32.mrf.mxu0 }
  0xd6   : > { %v481_v42 = vpop.f32.mrf.mxu1 }
  0xd7   : > { %v590_v43 = vmax.f32 %v527_v40, 0.0  ;;  %v482_v44 = vadd.f32 %v481_v42, %v368_v41 }
  0xd9   : > { %v575_v45 = vmax.f32 %v482_v44, 0.0  ;;  %v626_v46 = vmul.f32 %v2753_v35, %v590_v43 }
  0xdb   : > { %674 = vadd.xlane.f32.xlu1 %v626_v46  ;;  %v416_v47 = vpop.f32.mrf.mxu2  ;;  %v611_v48 = vmul.f32 %v2753_v35, %v575_v45 }
  0xdc   : > { %v529_v49 = vpop.f32.mrf.mxu3 }
  0xdd   : > { %v530_v50 = vadd.f32 %v529_v49, %v416_v47  ;;  %644 = vadd.xlane.f32.xlu0 %v611_v48  ;;  %v371_v51 = vpop.f32.mrf.mxu0 }
  0xde   : > { %v484_v52 = vpop.f32.mrf.mxu1 }
  0xdf   : > { %v591_v53 = vmax.f32 %v530_v50, 0.0  ;;  %v485_v54 = vadd.f32 %v484_v52, %v371_v51 }
  0xe1   : > { %v576_v55 = vmax.f32 %v485_v54, 0.0  ;;  %v627_v56 = vmul.f32 %v2753_v35, %v591_v53 }
  0xe3   : > { %676 = vadd.xlane.f32.xlu2 %v627_v56  ;;  %v419_v57 = vpop.f32.mrf.mxu2  ;;  %v612_v58 = vmul.f32 %v2753_v35, %v576_v55 }
  0xe4   : > { %v532_v59 = vpop.f32.mrf.mxu3 }
  0xe5   : > { %v533_v60 = vadd.f32 %v532_v59, %v419_v57  ;;  %646 = vadd.xlane.f32.xlu1 %v612_v58  ;;  %v374_v61 = vpop.f32.mrf.mxu0 }
  0xe6   : > { %v487_v62 = vpop.f32.mrf.mxu1 }
  0xe7   : > { %v592_v63 = vmax.f32 %v533_v60, 0.0  ;;  %v488_v0 = vadd.f32 %v487_v62, %v374_v61 }
  0xe9   : > { %v577_v1 = vmax.f32 %v488_v0, 0.0  ;;  %v628_v2 = vmul.f32 %v2753_v35, %v592_v63 }
  0xeb   : > { %678 = vadd.xlane.f32.xlu0 %v628_v2  ;;  %v422_v3 = vpop.f32.mrf.mxu2  ;;  %v613_v4 = vmul.f32 %v2753_v35, %v577_v1 }
  0xec   : > { %v535_v5 = vpop.f32.mrf.mxu3 }
  0xed   : > { %v536_v6 = vadd.f32 %v535_v5, %v422_v3  ;;  %648 = vadd.xlane.f32.xlu1 %v613_v4  ;;  %v377_v7 = vpop.f32.mrf.mxu0 }
  0xee   : > { %v490_v8 = vpop.f32.mrf.mxu1 }
  0xef   : > { %v593_v9 = vmax.f32 %v536_v6, 0.0  ;;  %v491_v10 = vadd.f32 %v490_v8, %v377_v7 }
  0xf1   : > { %v578_v11 = vmax.f32 %v491_v10, 0.0  ;;  %v629_v13 = vmul.f32 %v2753_v35, %v593_v9 }
  0xf3   : > { %v425_v12 = vpop.f32.mrf.mxu2  ;;  %v614_v14 = vmul.f32 %v2753_v35, %v578_v11 }
  0xf4   : > { %v538_v15 = vpop.f32.mrf.mxu3 }
  0xf5   : > { %v539_v16 = vadd.f32 %v538_v15, %v425_v12  ;;  %680 = vadd.xlane.f32.xlu1 %v629_v13  ;;  %650 = vadd.xlane.f32.xlu2 %v614_v14  ;;  %v380_v17 = vpop.f32.mrf.mxu0 }
  0xf6   : > { %v493_v18 = vpop.f32.mrf.mxu1 }
  0xf7   : > { %v594_v19 = vmax.f32 %v539_v16, 0.0  ;;  %v494_v21 = vadd.f32 %v493_v18, %v380_v17 }
  0xf9   : > { %v630_v22 = vmul.f32 %v2753_v35, %v594_v19  ;;  %v579_v27 = vmax.f32 %v494_v21, 0.0 }
  0xfb   : > { %v428_v20 = vpop.f32.mrf.mxu2  ;;  %v615_v33 = vmul.f32 %v2753_v35, %v579_v27 }
  0xfc   : > { %v541_v23 = vpop.f32.mrf.mxu3 }
  0xfd   : > { %v542_v24 = vadd.f32 %v541_v23, %v428_v20  ;;  %682 = vadd.xlane.f32.xlu2 %v630_v22  ;;  %v383_v25 = vpop.f32.mrf.mxu0 }
  0xfe   : > { %v496_v26 = vpop.f32.mrf.mxu1 }
  0xff   : > { %v595_v28 = vmax.f32 %v542_v24, 0.0  ;;  %v497_v29 = vadd.f32 %v496_v26, %v383_v25 }
 0x101   : > { %v631_v30 = vmul.f32 %v2753_v35, %v595_v28  ;;  %v580_v32 = vmax.f32 %v497_v29, 0.0 }
 0x103   : > { %684 = vadd.xlane.f32.xlu0 %v631_v30  ;;  %v431_v31 = vpop.f32.mrf.mxu2  ;;  %v616_v40 = vmul.f32 %v2753_v35, %v580_v32 }
 0x104   : > { %v544_v34 = vpop.f32.mrf.mxu3 }
 0x105   : > { %v545_v36 = vadd.f32 %v544_v34, %v431_v31  ;;  %652 = vadd.xlane.f32.xlu2 %v615_v33  ;;  %v386_v37 = vpop.f32.mrf.mxu0 }
 0x106   : > { %v499_v38 = vpop.f32.mrf.mxu1 }
 0x107   : > { %v596_v39 = vmax.f32 %v545_v36, 0.0  ;;  %v500_v41 = vadd.f32 %v499_v38, %v386_v37 }
 0x109   : > { %v632_v42 = vmul.f32 %v2753_v35, %v596_v39  ;;  %v581_v44 = vmax.f32 %v500_v41, 0.0 }
 0x10b   : > { %686 = vadd.xlane.f32.xlu1 %v632_v42  ;;  %654 = vadd.xlane.f32.xlu0 %v616_v40  ;;  %v434_v43 = vpop.f32.mrf.mxu2  ;;  %v617_v50 = vmul.f32 %v2753_v35, %v581_v44 }
 0x10c   : > { %v547_v45 = vpop.f32.mrf.mxu3 }
 0x10d   : > { %v548_v46 = vadd.f32 %v547_v45, %v434_v43  ;;  %v389_v47 = vpop.f32.mrf.mxu0 }
 0x10e   : > { %v502_v48 = vpop.f32.mrf.mxu1 }
 0x10f   : > { %v597_v49 = vmax.f32 %v548_v46, 0.0  ;;  %v503_v51 = vadd.f32 %v502_v48, %v389_v47 }
 0x111   : > { %v633_v52 = vmul.f32 %v2753_v35, %v597_v49  ;;  %v582_v54 = vmax.f32 %v503_v51, 0.0 }
 0x113   : > { %688 = vadd.xlane.f32.xlu2 %v633_v52  ;;  %656 = vadd.xlane.f32.xlu1 %v617_v50  ;;  %v437_v53 = vpop.f32.mrf.mxu2  ;;  %v618_v60 = vmul.f32 %v2753_v35, %v582_v54 }
 0x114   : > { %v550_v55 = vpop.f32.mrf.mxu3 }
 0x115   : > { %v551_v56 = vadd.f32 %v550_v55, %v437_v53  ;;  %v392_v57 = vpop.f32.mrf.mxu0 }
 0x116   : > { %v505_v58 = vpop.f32.mrf.mxu1 }
 0x117   : > { %v598_v59 = vmax.f32 %v551_v56, 0.0  ;;  %v506_v61 = vadd.f32 %v505_v58, %v392_v57 }
 0x119   : > { %v634_v62 = vmul.f32 %v2753_v35, %v598_v59  ;;  %v583_v0 = vmax.f32 %v506_v61, 0.0 }
 0x11b   : > { %690 = vadd.xlane.f32.xlu0 %v634_v62  ;;  %658 = vadd.xlane.f32.xlu2 %v618_v60  ;;  %v440_v63 = vpop.f32.mrf.mxu2  ;;  %v619_v6 = vmul.f32 %v2753_v35, %v583_v0 }
 0x11c   : > { %v553_v1 = vpop.f32.mrf.mxu3 }
 0x11d   : > { %v554_v2 = vadd.f32 %v553_v1, %v440_v63  ;;  %v395_v3 = vpop.f32.mrf.mxu0 }
 0x11e   : > { %v508_v4 = vpop.f32.mrf.mxu1 }
 0x11f   : > { %v599_v5 = vmax.f32 %v554_v2, 0.0  ;;  %v509_v7 = vadd.f32 %v508_v4, %v395_v3 }
 0x121   : > { %v635_v8 = vmul.f32 %v2753_v35, %v599_v5  ;;  %v584_v10 = vmax.f32 %v509_v7, 0.0 }
 0x123   : > { %692 = vadd.xlane.f32.xlu1 %v635_v8  ;;  %660 = vadd.xlane.f32.xlu0 %v619_v6  ;;  %v443_v9 = vpop.f32.mrf.mxu2  ;;  %v620_v16 = vmul.f32 %v2753_v35, %v584_v10 }
 0x124   : > { %v556_v11 = vpop.f32.mrf.mxu3 }
 0x125   : > { %v557_v12 = vadd.f32 %v556_v11, %v443_v9  ;;  %v398_v13 = vpop.f32.mrf.mxu0 }
 0x126   : > { %v511_v14 = vpop.f32.mrf.mxu1 }
 0x127   : > { %v600_v15 = vmax.f32 %v557_v12, 0.0  ;;  %v512_v17 = vadd.f32 %v511_v14, %v398_v13 }
 0x129   : > { %v636_v18 = vmul.f32 %v2753_v35, %v600_v15  ;;  %v585_v20 = vmax.f32 %v512_v17, 0.0 }
 0x12b   : > { %694 = vadd.xlane.f32.xlu2 %v636_v18  ;;  %662 = vadd.xlane.f32.xlu1 %v620_v16  ;;  %v446_v19 = vpop.f32.mrf.mxu2  ;;  %v621_v26 = vmul.f32 %v2753_v35, %v585_v20 }
 0x12c   : > { %v559_v21 = vpop.f32.mrf.mxu3 }
 0x12d   : > { %v560_v22 = vadd.f32 %v559_v21, %v446_v19  ;;  %v401_v23 = vpop.f32.mrf.mxu0 }
 0x12e   : > { %v514_v24 = vpop.f32.mrf.mxu1 }
 0x12f   : > { %v601_v25 = vmax.f32 %v560_v22, 0.0  ;;  %v515_v27 = vadd.f32 %v514_v24, %v401_v23  ;;  %v738_v23 = vlaneseq }
 0x131   : > { %v637_v28 = vmul.f32 %v2753_v35, %v601_v25  ;;  %v586_v30 = vmax.f32 %v515_v27, 0.0 }
 0x133   : > { %696 = vadd.xlane.f32.xlu0 %v637_v28  ;;  %664 = vadd.xlane.f32.xlu2 %v621_v26  ;;  %v449_v29 = vpop.f32.mrf.mxu2  ;;  %v622_v37 = vmul.f32 %v2753_v35, %v586_v30  ;;  %v2833_v26 = vand.u32 127, %v738_v23 }
 0x134   : > { %v562_v31 = vpop.f32.mrf.mxu3 }
 0x135   : > { %v563_v32 = vadd.f32 %v562_v31, %v449_v29  ;;  %v404_v33 = vpop.f32.mrf.mxu0  ;;  %v2838_v28 = vadd.s32 4294967288, %v2833_v26 }
 0x136   : > { %v517_v34 = vpop.f32.mrf.mxu1 }
 0x137   : > { %v602_v36 = vmax.f32 %v563_v32, 0.0  ;;  %v518_v38 = vadd.f32 %v517_v34, %v404_v33 }
 0x139   : > { %v638_v39 = vmul.f32 %v2753_v35, %v602_v36  ;;  %v587_v41 = vmax.f32 %v518_v38, 0.0 }
 0x13b   : > { %698 = vadd.xlane.f32.xlu1 %v638_v39  ;;  %666 = vadd.xlane.f32.xlu0 %v622_v37  ;;  %v452_v40 = vpop.f32.mrf.mxu2  ;;  %v623_v47 = vmul.f32 %v2753_v35, %v587_v41 }
 0x13c   : > { %v565_v42 = vpop.f32.mrf.mxu3 }
 0x13d   : > { %v566_v43 = vadd.f32 %v565_v42, %v452_v40  ;;  %v407_v44 = vpop.f32.mrf.mxu0 }
 0x13e   : > { %v520_v45 = vpop.f32.mrf.mxu1 }
 0x13f   : > { %v603_v46 = vmax.f32 %v566_v43, 0.0  ;;  %v521_v48 = vadd.f32 %v520_v45, %v407_v44 }
 0x141   : > { %v639_v49 = vmul.f32 %v2753_v35, %v603_v46  ;;  %v588_v51 = vmax.f32 %v521_v48, 0.0 }
 0x143   : > { %700 = vadd.xlane.f32.xlu2 %v639_v49  ;;  %668 = vadd.xlane.f32.xlu1 %v623_v47  ;;  %v455_v50 = vpop.f32.mrf.mxu2  ;;  %v624_v57 = vmul.f32 %v2753_v35, %v588_v51 }
 0x144   : > { %v568_v52 = vpop.f32.mrf.mxu3 }
 0x145   : > { %v569_v53 = vadd.f32 %v568_v52, %v455_v50  ;;  %v410_v54 = vpop.f32.mrf.mxu0 }
 0x146   : > { %v523_v55 = vpop.f32.mrf.mxu1 }
 0x147   : > { %v604_v56 = vmax.f32 %v569_v53, 0.0  ;;  %v524_v58 = vadd.f32 %v523_v55, %v410_v54 }
 0x148   : > { %v2789_v4 = vpop.xlane.xlu0 %642 }
 0x149   : > { %v640_v59 = vmul.f32 %v2753_v35, %v604_v56  ;;  %v589_v61 = vmax.f32 %v524_v58, 0.0  ;;  %v740_v38 = vperm.slane %v2789_v4, %v2833_v26 }
 0x14b   : > { %702 = vadd.xlane.f32.xlu0 %v640_v59  ;;  %670 = vadd.xlane.f32.xlu2 %v624_v57  ;;  %v458_v60 = vpop.f32.mrf.mxu2  ;;  %v625_v1 = vmul.f32 %v2753_v35, %v589_v61 }
 0x14c   : > { %v571_v62 = vpop.f32.mrf.mxu3 }
 0x14d   : > { %v572_v63 = vadd.f32 %v571_v62, %v458_v60 }
 0x14e   : > { %v2787_v3 = vpop.xlane.xlu1 %674 }
 0x14f   : > { %v605_v0 = vmax.f32 %v572_v63, 0.0  ;;  %v766_v41 = vperm.slane %v2787_v3, %v2833_v26 }
 0x150   : > { %v2795_v7 = vpop.xlane.xlu0 %644 }
 0x151   : > { %v641_v2 = vmul.f32 %v2753_v35, %v605_v0  ;;  %v742_v32 = vperm.slane %v2795_v7, %v2838_v28 }
 0x153   : > { %704 = vadd.xlane.f32.xlu1 %v641_v2  ;;  %672 = vadd.xlane.f32.xlu0 %v625_v1  ;;  %v744_v45 = vsel %vm743_vm0, %v742_v32, %v740_v38 }
 0x156   : > { %v2791_v5 = vpop.xlane.xlu2 %676 }
 0x157   : > { %v767_v34 = vperm.slane %v2791_v5, %v2838_v28 }
 0x158   : > { %v2793_v6 = vpop.xlane.xlu1 %646 }
 0x159   : > { %v745_v36 = vperm.slane %v2793_v6, %v2833_v26  ;;  %v768_v48 = vsel %vm743_vm0, %v767_v34, %v766_v41 }
 0x15e   : > { %v2801_v10 = vpop.xlane.xlu0 %678 }
 0x15f   : > { %v769_v39 = vperm.slane %v2801_v10, %v2833_v26 }
 0x160   : > { %v2799_v9 = vpop.xlane.xlu1 %648 }
 0x161   : > { %v746_v31 = vperm.slane %v2799_v9, %v2838_v28 }
 0x163   : > { %v747_v42 = vsel %vm743_vm0, %v746_v31, %v745_v36 }
 0x164   : > { %v791_v52 = vsel %vm790_vm1, %v747_v42, %v744_v45 }
 0x168   : > { %v2797_v8 = vpop.xlane.xlu2 %650  ;;  %v2805_v35 = vpop.xlane.xlu1 %680 }
 0x169   : > { %v770_v33 = vperm.slane %v2805_v35, %v2838_v28  ;;  %v748_v49 = vperm.slane %v2797_v8, %v2833_v26 }
 0x16b   : > { %v771_v46 = vsel %vm743_vm0, %v770_v33, %v769_v39 }
 0x16c   : > { %v804_v57 = vsel %vm790_vm1, %v771_v46, %v768_v48 }
 0x170   : > { %v2803_v11 = vpop.xlane.xlu2 %682 }
 0x171   : > { %v772_v43 = vperm.slane %v2803_v11, %v2833_v26 }
 0x176   : > { %v2807_v12 = vpop.xlane.xlu0 %684 }
 0x177   : > { %v773_v37 = vperm.slane %v2807_v12, %v2838_v28 }
 0x178   : > { %v2809_v13 = vpop.xlane.xlu2 %652 }
 0x179   : > { %v749_v44 = vperm.slane %v2809_v13, %v2838_v28  ;;  %v774_v50 = vsel %vm743_vm0, %v773_v37, %v772_v43 }
 0x17a   : > { %v805_v61 = vsel %vm792_vm2, %v774_v50, %v804_v57 }
 0x17b   : > { %v750_v58 = vsel %vm743_vm0, %v749_v44, %v748_v49 }
 0x17c   : > { %v793_v31 = vsel %vm792_vm2, %v750_v58, %v791_v52 }
 0x17e   : > { %v2811_v14 = vpop.xlane.xlu1 %686  ;;  %v2813_v15 = vpop.xlane.xlu0 %654 }
 0x17f   : > { %v775_v53 = vperm.slane %v2811_v14, %v2833_v26  ;;  %v751_v59 = vperm.slane %v2813_v15, %v2833_v26 }
 0x186   : > { %v2815_v16 = vpop.xlane.xlu2 %688  ;;  %v2817_v17 = vpop.xlane.xlu1 %656 }
 0x187   : > { %v776_v47 = vperm.slane %v2815_v16, %v2838_v28  ;;  %v752_v51 = vperm.slane %v2817_v17, %v2838_v28 }
 0x189   : > { %v777_v62 = vsel %vm743_vm0, %v776_v47, %v775_v53  ;;  %v753_v0 = vsel %vm743_vm0, %v752_v51, %v751_v59 }
 0x18a   : > { %v806_v39 = vsel %vm794_vm3, %v777_v62, %v805_v61  ;;  %v795_v41 = vsel %vm794_vm3, %v753_v0, %v793_v31 }
 0x18e   : > { %v2819_v18 = vpop.xlane.xlu0 %690  ;;  %v2821_v19 = vpop.xlane.xlu2 %658 }
 0x18f   : > { %v778_v63 = vperm.slane %v2819_v18, %v2833_v26  ;;  %v754_v1 = vperm.slane %v2821_v19, %v2833_v26 }
 0x196   : > { %v2823_v20 = vpop.xlane.xlu1 %692  ;;  %v2825_v21 = vpop.xlane.xlu0 %660 }
 0x197   : > { %v779_v54 = vperm.slane %v2823_v20, %v2838_v28  ;;  %v755_v60 = vperm.slane %v2825_v21, %v2838_v28 }
 0x199   : > { %v780_v32 = vsel %vm743_vm0, %v779_v54, %v778_v63  ;;  %v756_v36 = vsel %vm743_vm0, %v755_v60, %v754_v1 }
 0x19a   : > { %v807_v47 = vsel %vm796_vm4, %v780_v32, %v806_v39  ;;  %v797_v52 = vsel %vm796_vm4, %v756_v36, %v795_v41  ;;  %v2549_v32 = vmov 0  }
 0x19b   : > { %2278 = vset.pattern.permute.xlu0 %v2549_v32  ;;  %2277 = vset.pattern.permute.xlu2 %v2549_v32 }
 0x19c   : > { %2276 = vset.pattern.permute.xlu1 %v2549_v32 }
 0x19e   : > { %v2827_v22 = vpop.xlane.xlu2 %694  ;;  %v2829_v24 = vpop.xlane.xlu1 %662 }
 0x19f   : > { %v781_v37 = vperm.slane %v2827_v22, %v2833_v26  ;;  %v757_v38 = vperm.slane %v2829_v24, %v2833_v26 }
 0x1a6   : > { %v2831_v25 = vpop.xlane.xlu0 %696  ;;  %v2835_v27 = vpop.xlane.xlu2 %664 }
 0x1a7   : > { %v782_v2 = vperm.slane %v2831_v25, %v2838_v28  ;;  %v758_v23 = vperm.slane %v2835_v27, %v2838_v28 }
 0x1a9   : > { %v783_v45 = vsel %vm743_vm0, %v782_v2, %v781_v37  ;;  %v759_v46 = vsel %vm743_vm0, %v758_v23, %v757_v38 }
 0x1aa   : > { %v808_v59 = vsel %vm798_vm5, %v783_v45, %v807_v47  ;;  %v799_v60 = vsel %vm798_vm5, %v759_v46, %v797_v52 }
 0x1ae   : > { %v2840_v29 = vpop.xlane.xlu1 %698  ;;  %v2842_v30 = vpop.xlane.xlu0 %666 }
 0x1af   : > { %v784_v42 = vperm.slane %v2840_v29, %v2833_v26  ;;  %v760_v43 = vperm.slane %v2842_v30, %v2833_v26 }
 0x1b6   : > { %v2860_v40 = vpop.xlane.xlu2 %700  ;;  %v2884_v55 = vpop.xlane.xlu1 %668 }
 0x1b7   : > { %v785_v33 = vperm.slane %v2860_v40, %v2838_v28  ;;  %v761_v34 = vperm.slane %v2884_v55, %v2838_v28 }
 0x1b9   : > { %v786_v50 = vsel %vm743_vm0, %v785_v33, %v784_v42  ;;  %v762_v51 = vsel %vm743_vm0, %v761_v34, %v760_v43 }
 0x1ba   : > { %v809_v62 = vsel %vm800_vm6, %v786_v50, %v808_v59  ;;  %v801_v0 = vsel %vm800_vm6, %v762_v51, %v799_v60 }
 0x1be   : > { %v2886_v56 = vpop.xlane.xlu0 %702  ;;  %v2922_v44 = vpop.xlane.xlu2 %670 }
 0x1bf   : > { %v787_v53 = vperm.slane %v2886_v56, %v2833_v26  ;;  %v763_v54 = vperm.slane %v2922_v44, %v2833_v26 }
 0x1c6   : > { %v2927_v48 = vpop.xlane.xlu1 %704  ;;  %v2929_v49 = vpop.xlane.xlu0 %672 }
 0x1c7   : > { %v788_v57 = vperm.slane %v2927_v48, %v2838_v28  ;;  %v764_v58 = vperm.slane %v2929_v49, %v2838_v28 }
 0x1c9   : > { %v789_v61 = vsel %vm743_vm0, %v788_v57, %v787_v53  ;;  %v765_v63 = vsel %vm743_vm0, %v764_v58, %v763_v54 }
 0x1ca   : > { %v810_v1 = vsel %vm802_vm7, %v789_v61, %v809_v62  ;;  %v803_v2 = vsel %vm802_vm7, %v765_v63, %v801_v0 }
 0x1cb   : > { %v817_v23 = vsel %vm813_vm8, %v810_v1, -inf  ;;  %v814_v31 = vsel %vm813_vm8, %v803_v2, -inf }
 0x1cc   : > { %818 = vmax.xlane.f32.xlu0 %v817_v23  ;;  %815 = vmax.xlane.f32.xlu2 %v814_v31 }
 0x23f   : > { %v2952_v33 = vpop.xlane.xlu2 %815  ;;  %v2990_v1 = vpop.xlane.xlu0 %818 }
 0x240   : > { %v823_v34 = vperm.slane %v2952_v33, 1  ;;  %v822_v36 = vperm.slane %v2952_v33, 0  ;;  %v826_v41 = vperm.slane %v2952_v33, 4  ;;  %v824_v42 = vperm.slane %v2952_v33, 2 }
 0x241   : > { %v825_v54 = vperm.slane %v2952_v33, 3  ;;  %v829_v60 = vperm.slane %v2952_v33, 7  ;;  %v831_v31 = vperm.slane %v2990_v1, 1 }
 0x242   : > { %v856_v37 = vsub.f32 %v2793_v6, %v823_v34  ;;  %v855_v38 = vsub.f32 %v2795_v7, %v822_v36  ;;  %v854_v39 = vsub.f32 %v2789_v4, %v822_v36  ;;  %v863_v47 = vsub.f32 %v2825_v21, %v826_v41 }
 0x243   : > { %v857_v50 = vsub.f32 %v2799_v9, %v823_v34  ;;  %v858_v6 = vsub.f32 %v2797_v8, %v824_v42  ;;  %v828_v7 = vperm.slane %v2952_v33, 6  ;;  %v859_v9 = vsub.f32 %v2809_v13, %v824_v42 }
 0x244   : > { %v890_v43 = vmul.f32 1.442695, %v856_v37  ;;  %v888_v45 = vmul.f32 1.442695, %v855_v38  ;;  %v886_v46 = vmul.f32 1.442695, %v854_v39  ;;  %v860_v58 = vsub.f32 %v2813_v15, %v825_v54 }
 0x245   : > { %v904_v51 = vmul.f32 1.442695, %v863_v47  ;;  %v892_v4 = vmul.f32 1.442695, %v857_v50  ;;  %v894_v53 = vmul.f32 1.442695, %v858_v6  ;;  %v866_v8 = vsub.f32 %v2842_v30, %v828_v7 }
 0x246   : > { %2280 = vpow2.f32 %v890_v43  ;;  %v896_v61 = vmul.f32 1.442695, %v859_v9  ;;  %v898_v63 = vmul.f32 1.442695, %v860_v58  ;;  %v869_v13 = vsub.f32 %v2929_v49, %v829_v60 }
 0x247   : > { %2282 = vpow2.f32 %v888_v45  ;;  %v910_v59 = vmul.f32 1.442695, %v866_v8  ;;  %v861_v15 = vsub.f32 %v2817_v17, %v825_v54  ;;  %v862_v2 = vsub.f32 %v2821_v19, %v826_v41 }
 0x248   : > { %2284 = vpow2.f32 %v886_v46  ;;  %v916_v23 = vmul.f32 1.442695, %v869_v13  ;;  %v827_v34 = vperm.slane %v2952_v33, 5  ;;  %v872_v17 = vsub.f32 %v2801_v10, %v831_v31 }
 0x249   : > { %2286 = vpow2.f32 %v904_v51  ;;  %v900_v32 = vmul.f32 1.442695, %v861_v15  ;;  %v902_v37 = vmul.f32 1.442695, %v862_v2  ;;  %v832_v42 = vperm.slane %v2990_v1, 2 }
 0x24a   : > { %2288 = vpow2.f32 %v892_v4  ;;  %v864_v19 = vsub.f32 %v2829_v24, %v827_v34  ;;  %v865_v39 = vsub.f32 %v2835_v27, %v827_v34  ;;  %v922_v41 = vmul.f32 1.442695, %v872_v17 }
 0x24b   : > { %2290 = vpow2.f32 %v894_v53  ;;  %v875_v24 = vsub.f32 %v2807_v12, %v832_v42  ;;  %v867_v27 = vsub.f32 %v2884_v55, %v828_v7  ;;  %v868_v50 = vsub.f32 %v2922_v44, %v829_v60 }
 0x24c   : > { %v2965_v52 = vpop.eup %2280  ;;  %2292 = vpow2.f32 %v910_v59  ;;  %v906_v43 = vmul.f32 1.442695, %v864_v19  ;;  %v908_v46 = vmul.f32 1.442695, %v865_v39  ;;  %v834_v51 = vperm.slane %v2990_v1, 4 }
 0x24d   : > { %v2968_v57 = vpop.eup %2282  ;;  %989 = vperm.xlu0 %2278, %v2965_v52   ;;  %2294 = vpow2.f32 %v896_v61  ;;  %v928_v6 = vmul.f32 1.442695, %v875_v24  ;;  %v912_v4 = vmul.f32 1.442695, %v867_v27  ;;  %v830_v53 = vperm.slane %v2990_v1, 0 }
 0x24e   : > { %v2971_v21 = vpop.eup %2284  ;;  %986 = vperm.xlu2 %2277, %v2968_v57   ;;  %2296 = vpow2.f32 %v898_v63  ;;  %v914_v8 = vmul.f32 1.442695, %v868_v50  ;;  %v878_v55 = vsub.f32 %v2819_v18, %v834_v51  ;;  %v835_v58 = vperm.slane %v2990_v1, 5 }
 0x24f   : > { %983 = vperm.xlu1 %2276, %v2971_v21   ;;  %v2981_v62 = vpop.eup %2286  ;;  %2298 = vpow2.f32 %v916_v23  ;;  %v870_v44 = vsub.f32 %v2787_v3, %v830_v53  ;;  %v871_v33 = vsub.f32 %v2791_v5, %v830_v53  ;;  %v873_v5 = vsub.f32 %v2805_v35, %v831_v31 }
 0x250   : > { %v2983_v0 = vpop.eup %2288  ;;  %2300 = vpow2.f32 %v900_v32  ;;  %v934_v7 = vmul.f32 1.442695, %v878_v55  ;;  %v881_v3 = vsub.f32 %v2831_v25, %v835_v58  ;;  %v874_v13 = vsub.f32 %v2803_v11, %v832_v42 }
 0x251   : > { %v2986_v30 = vpop.eup %2290  ;;  %2302 = vpow2.f32 %v902_v37  ;;  %v918_v59 = vmul.f32 1.442695, %v870_v44  ;;  %v920_v61 = vmul.f32 1.442695, %v871_v33  ;;  %v837_v2 = vperm.slane %v2990_v1, 7 }
 0x252   : > { %v2997_v36 = vpop.eup %2292  ;;  %2304 = vpow2.f32 %v922_v41  ;;  %v940_v15 = vmul.f32 1.442695, %v881_v3  ;;  %v924_v23 = vmul.f32 1.442695, %v873_v5  ;;  %v833_v32 = vperm.slane %v2990_v1, 3 }
 0x253   : > { %v2999_v49 = vpop.eup %2294  ;;  %2306 = vpow2.f32 %v906_v43  ;;  %v926_v37 = vmul.f32 1.442695, %v874_v13  ;;  %v884_v11 = vsub.f32 %v2886_v56, %v837_v2  ;;  %v836_v24 = vperm.slane %v2990_v1, 6 }
 0x254   : > { %v3002_v38 = vpop.eup %2296  ;;  %2308 = vpow2.f32 %v908_v46  ;;  %v876_v35 = vsub.f32 %v2811_v14, %v833_v32  ;;  %v877_v31 = vsub.f32 %v2815_v16, %v833_v32  ;;  %v879_v14 = vsub.f32 %v2823_v20, %v834_v51 }
 0x255   : > { %1010 = vperm.xlu0 %2278, %v2981_v62   ;;  %v3010_v45 = vpop.eup %2298  ;;  %2310 = vpow2.f32 %v928_v6  ;;  %v946_v19 = vmul.f32 1.442695, %v884_v11  ;;  %v880_v16 = vsub.f32 %v2827_v22, %v835_v58  ;;  %v882_v20 = vsub.f32 %v2840_v29, %v836_v24 }
 0x256   : > { %992 = vperm.xlu2 %2277, %v2983_v0   ;;  %v3012_v47 = vpop.eup %2300  ;;  %2312 = vpow2.f32 %v912_v4  ;;  %v930_v39 = vmul.f32 1.442695, %v876_v35  ;;  %v932_v42 = vmul.f32 1.442695, %v877_v31  ;;  %v936_v56 = vmul.f32 1.442695, %v879_v14 }
 0x257   : > { %995 = vperm.xlu1 %2276, %v2986_v30   ;;  %v3015_v10 = vpop.eup %2302  ;;  %2314 = vpow2.f32 %v914_v8  ;;  %v938_v50 = vmul.f32 1.442695, %v880_v16  ;;  %v883_v22 = vsub.f32 %v2860_v40, %v836_v24  ;;  %v942_v1 = vmul.f32 1.442695, %v882_v20 }
 0x258   : > { %v3026_v54 = vpop.eup %2304  ;;  %2316 = vpow2.f32 %v934_v7  ;;  %v885_v55 = vsub.f32 %v2927_v48, %v837_v2 }
 0x259   : > { %v3028_v12 = vpop.eup %2306  ;;  %2318 = vpow2.f32 %v918_v59  ;;  %v944_v51 = vmul.f32 1.442695, %v883_v22 }
 0x25a   : > { %v3031_v9 = vpop.eup %2308  ;;  %2320 = vpow2.f32 %v920_v61  ;;  %v948_v44 = vmul.f32 1.442695, %v885_v55 }
 0x25b   : > { %v3039_v60 = vpop.eup %2310  ;;  %2322 = vpow2.f32 %v940_v15 }
 0x25c   : > { %v3041_v63 = vpop.eup %2312  ;;  %2324 = vpow2.f32 %v924_v23 }
 0x25d   : > { %1019 = vperm.xlu0 %2278, %v2997_v36   ;;  %v3044_v18 = vpop.eup %2314  ;;  %2326 = vpow2.f32 %v926_v37 }
 0x25e   : > { %998 = vperm.xlu2 %2277, %v2999_v49   ;;  %v3053_v34 = vpop.eup %2316  ;;  %2328 = vpow2.f32 %v946_v19 }
 0x25f   : > { %1001 = vperm.xlu1 %2276, %v3002_v38   ;;  %v3055_v17 = vpop.eup %2318  ;;  %2330 = vpow2.f32 %v930_v39 }
 0x260   : > { %v3058_v25 = vpop.eup %2320  ;;  %2332 = vpow2.f32 %v932_v42 }
 0x261   : > { %v3065_v41 = vpop.eup %2322  ;;  %2334 = vpow2.f32 %v936_v56 }
 0x262   : > { %v3067_v43 = vpop.eup %2324  ;;  %2336 = vpow2.f32 %v938_v50 }
 0x263   : > { %v3070_v46 = vpop.eup %2326  ;;  %2338 = vpow2.f32 %v942_v1 }
 0x264   : > { %v3077_v27 = vpop.eup %2328  ;;  %2340 = vpow2.f32 %v944_v51 }
 0x265   : > { %1028 = vperm.xlu0 %2278, %v3010_v45   ;;  %v3079_v6 = vpop.eup %2330  ;;  %2342 = vpow2.f32 %v948_v44 }
 0x266   : > { %1004 = vperm.xlu2 %2277, %v3012_v47   ;;  %v3082_v4 = vpop.eup %2332 }
 0x267   : > { %1007 = vperm.xlu1 %2276, %v3015_v10   ;;  %v3088_v53 = vpop.eup %2334 }
 0x268   : > { %v3090_v8 = vpop.eup %2336 }
 0x269   : > { %v3095_v33 = vpop.eup %2338 }
 0x26a   : > { %v3097_v29 = vpop.eup %2340 }
 0x26b   : > { %v3101_v40 = vpop.eup %2342 }
 0x26d   : > { %1037 = vperm.xlu0 %2278, %v3026_v54  }
 0x26e   : > { %1013 = vperm.xlu2 %2277, %v3028_v12  }
 0x26f   : > { %1016 = vperm.xlu1 %2276, %v3031_v9  }
 0x275   : > { %1046 = vperm.xlu0 %2278, %v3039_v60  }
 0x276   : > { %1022 = vperm.xlu2 %2277, %v3041_v63  }
 0x277   : > { %1025 = vperm.xlu1 %2276, %v3044_v18  }
 0x27d   : > { %1055 = vperm.xlu0 %2278, %v3053_v34  }
 0x27e   : > { %1031 = vperm.xlu2 %2277, %v3055_v17  }
 0x27f   : > { %1034 = vperm.xlu1 %2276, %v3058_v25  }
 0x285   : > { %1064 = vperm.xlu0 %2278, %v3065_v41  }
 0x286   : > { %1040 = vperm.xlu2 %2277, %v3067_v43  }
 0x287   : > { %1043 = vperm.xlu1 %2276, %v3070_v46  }
 0x28d   : > { %1073 = vperm.xlu0 %2278, %v3077_v27  }
 0x28e   : > { %1049 = vperm.xlu2 %2277, %v3079_v6  }
 0x28f   : > { %1052 = vperm.xlu1 %2276, %v3082_v4  }
 0x296   : > { %1058 = vperm.xlu2 %2277, %v3088_v53  }
 0x297   : > { %1061 = vperm.xlu1 %2276, %v3090_v8  }
 0x29e   : > { %1067 = vperm.xlu2 %2277, %v3095_v33  }
 0x29f   : > { %1070 = vperm.xlu1 %2276, %v3097_v29  }
 0x2a6   : > { %1076 = vperm.xlu2 %2277, %v3101_v40  }
 0x2a8   : > { %v987_v7 = vpop.permute.xlu2 %986 }
 0x2a9   : > { %v1079_v42 = vperm.slane %v987_v7, %v2838_v28 }
 0x2b0   : > { %v993_v58 = vpop.permute.xlu2 %992 }
 0x2b1   : > { %v1082_v14 = vperm.slane %v993_v58, %v2838_v28 }
 0x2b8   : > { %v999_v59 = vpop.permute.xlu2 %998 }
 0x2b9   : > { %v1085_v56 = vperm.slane %v999_v59, %v2838_v28 }
 0x2bf   : > { %v990_v61 = vpop.permute.xlu0 %989 }
 0x2c0   : > { %v1005_v48 = vpop.permute.xlu2 %1004  ;;  %v1081_v19 = vperm.slane %v990_v61, %v2833_v26 }
 0x2c1   : > { %v984_v3 = vpop.permute.xlu1 %983  ;;  %v1088_v20 = vperm.slane %v1005_v48, %v2838_v28 }
 0x2c2   : > { %v1078_v31 = vperm.slane %v984_v3, %v2833_v26  ;;  %v1083_v1 = vsel %vm743_vm0, %v1082_v14, %v1081_v19 }
 0x2c4   : > { %v1080_v22 = vsel %vm743_vm0, %v1079_v42, %v1078_v31 }
 0x2c5   : > { %v1126_v59 = vsel %vm790_vm1, %v1083_v1, %v1080_v22 }
 0x2c7   : > { %v1011_v13 = vpop.permute.xlu0 %1010 }
 0x2c8   : > { %v1014_v5 = vpop.permute.xlu2 %1013  ;;  %v1091_v44 = vperm.slane %v1011_v13, %v2838_v28 }
 0x2c9   : > { %v996_v15 = vpop.permute.xlu1 %995  ;;  %v1093_v7 = vperm.slane %v1014_v5, %v2833_v26 }
 0x2ca   : > { %v1084_v39 = vperm.slane %v996_v15, %v2833_v26 }
 0x2cc   : > { %v1086_v55 = vsel %vm743_vm0, %v1085_v56, %v1084_v39 }
 0x2cd   : > { %v1127_v48 = vsel %vm792_vm2, %v1086_v55, %v1126_v59 }
 0x2cf   : > { %v1020_v32 = vpop.permute.xlu0 %1019 }
 0x2d0   : > { %v1023_v23 = vpop.permute.xlu2 %1022  ;;  %v1096_v13 = vperm.slane %v1020_v32, %v2833_v26 }
 0x2d1   : > { %v1002_v2 = vpop.permute.xlu1 %1001 }
 0x2d2   : > { %v1087_v16 = vperm.slane %v1002_v2, %v2833_v26 }
 0x2d4   : > { %v1089_v58 = vsel %vm743_vm0, %v1088_v20, %v1087_v16 }
 0x2d5   : > { %v1128_v31 = vsel %vm794_vm3, %v1089_v58, %v1127_v48 }
 0x2d7   : > { %v1029_v35 = vpop.permute.xlu0 %1028 }
 0x2d8   : > { %v1032_v11 = vpop.permute.xlu2 %1031  ;;  %v1100_v42 = vperm.slane %v1029_v35, %v2838_v28 }
 0x2d9   : > { %v1008_v37 = vpop.permute.xlu1 %1007 }
 0x2da   : > { %v1090_v24 = vperm.slane %v1008_v37, %v2833_v26  ;;  %v1097_v37 = vperm.slane %v1023_v23, %v2838_v28 }
 0x2dc   : > { %v1092_v61 = vsel %vm743_vm0, %v1091_v44, %v1090_v24  ;;  %v1098_v16 = vsel %vm743_vm0, %v1097_v37, %v1096_v13 }
 0x2dd   : > { %v1129_v5 = vsel %vm796_vm4, %v1092_v61, %v1128_v31  ;;  %v1102_v61 = vperm.slane %v1032_v11, %v2833_v26 }
 0x2df   : > { %v1038_v2 = vpop.permute.xlu0 %1037 }
 0x2e0   : > { %v1041_v15 = vpop.permute.xlu2 %1040 }
 0x2e1   : > { %v1017_v50 = vpop.permute.xlu1 %1016  ;;  %v1106_v48 = vperm.slane %v1041_v15, %v2838_v28 }
 0x2e2   : > { %v1094_v51 = vperm.slane %v1017_v50, %v2838_v28 }
 0x2e4   : > { %v1095_v3 = vsel %vm743_vm0, %v1094_v51, %v1093_v7 }
 0x2e5   : > { %v1130_v39 = vsel %vm798_vm5, %v1095_v3, %v1129_v5  ;;  %v1105_v3 = vperm.slane %v1038_v2, %v2833_v26 }
 0x2e6   : > { %v1131_v24 = vsel %vm800_vm6, %v1098_v16, %v1130_v39 }
 0x2e7   : > { %v1047_v20 = vpop.permute.xlu0 %1046 }
 0x2e8   : > { %v1050_v32 = vpop.permute.xlu2 %1049  ;;  %v1109_v13 = vperm.slane %v1047_v20, %v2838_v28 }
 0x2e9   : > { %v1026_v19 = vpop.permute.xlu1 %1025  ;;  %v1111_v5 = vperm.slane %v1050_v32, %v2833_v26 }
 0x2ea   : > { %v1099_v14 = vperm.slane %v1026_v19, %v2833_v26 }
 0x2ec   : > { %v1101_v56 = vsel %vm743_vm0, %v1100_v42, %v1099_v14  ;;  %v1107_v42 = vsel %vm743_vm0, %v1106_v48, %v1105_v3 }
 0x2ed   : > { %v1132_v23 = vsel %vm802_vm7, %v1101_v56, %v1131_v24 }
 0x2ee   : > { %v1142_v50 = vsel %vm813_vm8, %v1132_v23, 0.0 }
 0x2ef   : > { %1143 = vadd.xlane.f32.xlu1 %v1142_v50  ;;  %v1056_v55 = vpop.permute.xlu0 %1055 }
 0x2f0   : > { %v1059_v51 = vpop.permute.xlu2 %1058  ;;  %v1114_v16 = vperm.slane %v1056_v55, %v2833_v26 }
 0x2f1   : > { %v1035_v22 = vpop.permute.xlu1 %1034  ;;  %v1115_v2 = vperm.slane %v1059_v51, %v2838_v28 }
 0x2f2   : > { %v1103_v58 = vperm.slane %v1035_v22, %v2838_v28 }
 0x2f4   : > { %v1104_v19 = vsel %vm743_vm0, %v1103_v58, %v1102_v61  ;;  %v1116_v58 = vsel %vm743_vm0, %v1115_v2, %v1114_v16 }
 0x2f5   : > { %v1133_v15 = vsel %vm790_vm1, %v1107_v42, %v1104_v19 }
 0x2f7   : > { %v1065_v7 = vpop.permute.xlu0 %1064 }
 0x2f8   : > { %v1068_v44 = vpop.permute.xlu2 %1067  ;;  %v1118_v50 = vperm.slane %v1065_v7, %v2838_v28 }
 0x2f9   : > { %v1044_v1 = vpop.permute.xlu1 %1043  ;;  %v1120_v51 = vperm.slane %v1068_v44, %v2833_v26 }
 0x2fa   : > { %v1108_v59 = vperm.slane %v1044_v1, %v2833_v26 }
 0x2fc   : > { %v1110_v39 = vsel %vm743_vm0, %v1109_v13, %v1108_v59 }
 0x2fd   : > { %v1134_v23 = vsel %vm792_vm2, %v1110_v39, %v1133_v15 }
 0x2ff   : > { %v1074_v24 = vpop.permute.xlu0 %1073 }
 0x300   : > { %v1077_v56 = vpop.permute.xlu2 %1076  ;;  %v1123_v22 = vperm.slane %v1074_v24, %v2833_v26 }
 0x301   : > { %v1053_v35 = vpop.permute.xlu1 %1052  ;;  %v1124_v20 = vperm.slane %v1077_v56, %v2838_v28 }
 0x302   : > { %v1112_v37 = vperm.slane %v1053_v35, %v2838_v28 }
 0x303   : > { %v1125_v48 = vsel %vm743_vm0, %v1124_v20, %v1123_v22 }
 0x304   : > { %v1113_v14 = vsel %vm743_vm0, %v1112_v37, %v1111_v5 }
 0x305   : > { %v1135_v32 = vsel %vm794_vm3, %v1113_v14, %v1134_v23 }
 0x306   : > { %v1136_v59 = vsel %vm796_vm4, %v1116_v58, %v1135_v32 }
 0x309   : > { %v1062_v31 = vpop.permute.xlu1 %1061 }
 0x30a   : > { %v1117_v11 = vperm.slane %v1062_v31, %v2833_v26 }
 0x30c   : > { %v1119_v1 = vsel %vm743_vm0, %v1118_v50, %v1117_v11 }
 0x30d   : > { %v1137_v7 = vsel %vm798_vm5, %v1119_v1, %v1136_v59 }
 0x311   : > { %v1071_v35 = vpop.permute.xlu1 %1070 }
 0x312   : > { %v1121_v55 = vperm.slane %v1071_v35, %v2838_v28 }
 0x314   : > { %v1122_v61 = vsel %vm743_vm0, %v1121_v55, %v1120_v51 }
 0x315   : > { %v1138_v3 = vsel %vm800_vm6, %v1122_v61, %v1137_v7 }
 0x316   : > { %v1139_v37 = vsel %vm802_vm7, %v1125_v48, %v1138_v3  ;;  %v2348_v48 = vld [vmem:[%s2676_s5] sm:$0xff]  ;;  %v2349_v3 = vld [vmem:[%s2676_s5 + $0x8] sm:$0xff] }
 0x317   : > { %v1145_v31 = vsel %vm813_vm8, %v1139_v37, 0.0 }
 0x318   : > { %1146 = vadd.xlane.f32.xlu0 %v1145_v31 }
 0x362   : > { %v1144_v13 = vpop.xlane.xlu1 %1143 }
 0x363   : > { %2344 = vrcp.f32 %v1144_v13 }
 0x369   : > { %v3168_v44 = vpop.eup %2344 }
 0x36a   : > { %v1157_v5 = vperm.slane %v3168_v44, 5  ;;  %v1152_v19 = vperm.slane %v3168_v44, 0  ;;  %v1159_v39 = vperm.slane %v3168_v44, 7  ;;  %v1153_v15 = vperm.slane %v3168_v44, 1 }
 0x36c   : > { %v1194_v42 = vmul.f32 %v3028_v12, %v1157_v5  ;;  %v1184_v14 = vmul.f32 %v2971_v21, %v1152_v19  ;;  %v1198_v11 = vmul.f32 %v3044_v18, %v1159_v39  ;;  %v1185_v2 = vmul.f32 %v2968_v57, %v1152_v19  ;;  %v2351_v19 = vld [vmem:[%s2676_s5 + $0x28] sm:$0xff] }
 0x36d   : > { %v1186_v16 = vmul.f32 %v2965_v52, %v1153_v15  ;;  %v1187_v56 = vmul.f32 %v2983_v0, %v1153_v15  ;;  %v1155_v21 = vperm.slane %v3168_v44, 3  ;;  %v1154_v12 = vperm.slane %v3168_v44, 2 }
 0x36e   : > { %1243 = vperm.xlu1 %2276, %v1194_v42   ;;  %1218 = vperm.xlu2 %2277, %v1184_v14   ;;  %v1156_v18 = vperm.slane %v3168_v44, 4  ;;  %v1158_v52 = vperm.slane %v3168_v44, 6 }
 0x36f   : > { %1253 = vperm.xlu0 %2278, %v1198_v11   ;;  %v1191_v24 = vmul.f32 %v3012_v47, %v1155_v21  ;;  %v1188_v23 = vmul.f32 %v2986_v30, %v1154_v12  ;;  %v1190_v0 = vmul.f32 %v3002_v38, %v1155_v21  ;;  %v1189_v58 = vmul.f32 %v2999_v49, %v1154_v12 }
 0x370   : > { %v1193_v50 = vmul.f32 %v2981_v62, %v1156_v18  ;;  %v1197_v57 = vmul.f32 %v3041_v63, %v1158_v52  ;;  %v1192_v20 = vmul.f32 %v3015_v10, %v1156_v18  ;;  %v1196_v62 = vmul.f32 %v2997_v36, %v1158_v52  ;;  %v2353_v52 = vld [vmem:[%s2676_s5 + $0x48] sm:$0xff] }
 0x376   : > { %1554 = vperm.xlu1 %2276, %v1185_v2   ;;  %1223 = vperm.xlu2 %2277, %v1186_v16  }
 0x377   : > { %1559 = vperm.xlu0 %2278, %v1187_v56  }
 0x37e   : > { %1569 = vperm.xlu1 %2276, %v1191_v24   ;;  %1228 = vperm.xlu2 %2277, %v1188_v23   ;;  %v2352_v23 = vld [vmem:[%s2676_s5 + $0x40] sm:$0xff] }
 0x37f   : > { %1574 = vperm.xlu0 %2278, %v1193_v50  }
 0x386   : > { %1584 = vperm.xlu1 %2276, %v1197_v57   ;;  %1233 = vperm.xlu2 %2277, %v1190_v0  }
 0x38b   : > { %v1147_v32 = vpop.xlane.xlu0 %1146 }
 0x38c   : > { %2346 = vrcp.f32 %v1147_v32 }
 0x38e   : > { %1238 = vperm.xlu2 %2277, %v1192_v20  }
 0x392   : > { %v2347_v47 = vpop.eup %2346 }
 0x393   : > { %v1163_v30 = vperm.slane %v2347_v47, 3  ;;  %v1162_v22 = vperm.slane %v2347_v47, 2  ;;  %v1166_v38 = vperm.slane %v2347_v47, 6  ;;  %v1165_v63 = vperm.slane %v2347_v47, 5 }
 0x394   : > { %v1161_v55 = vperm.slane %v2347_v47, 1  ;;  %v1160_v36 = vperm.slane %v2347_v47, 0  ;;  %v1164_v61 = vperm.slane %v2347_v47, 4 }
 0x395   : > { %v1206_v1 = vmul.f32 %v3079_v6, %v1163_v30  ;;  %v1204_v35 = vmul.f32 %v3070_v46, %v1162_v22  ;;  %v1212_v51 = vmul.f32 %v3095_v33, %v1166_v38  ;;  %v1210_v10 = vmul.f32 %v3090_v8, %v1165_v63 }
 0x396   : > { %1248 = vperm.xlu2 %2277, %v1196_v62   ;;  %v1195_v6 = vmul.f32 %v3031_v9, %v1157_v5  ;;  %v1203_v46 = vmul.f32 %v3067_v43, %v1161_v55  ;;  %v1201_v59 = vmul.f32 %v3058_v25, %v1160_v36  ;;  %v1200_v49 = vmul.f32 %v3055_v17, %v1160_v36  ;;  %v2350_v5 = vld [vmem:[%s2676_s5 + $0x20] sm:$0xff] }
 0x397   : > { %1273 = vperm.xlu0 %2278, %v1206_v1   ;;  %1268 = vperm.xlu1 %2276, %v1204_v35   ;;  %v1209_v33 = vmul.f32 %v3088_v53, %v1164_v61  ;;  %v1207_v8 = vmul.f32 %v3082_v4, %v1163_v30  ;;  %v1167_v9 = vperm.slane %v2347_v47, 7  ;;  %v1202_v43 = vmul.f32 %v3026_v54, %v1161_v55  ;;  %v2354_v36 = vld [vmem:[%s2676_s5 + $0xa0] sm:$0xff] }
 0x398   : > { %v1213_v25 = vmul.f32 %v3097_v29, %v1166_v38  ;;  %v1208_v17 = vmul.f32 %v3053_v34, %v1164_v61  ;;  %v1205_v37 = vmul.f32 %v3039_v60, %v1162_v22  ;;  %v1211_v2 = vmul.f32 %v3065_v41, %v1165_v63 }
 0x399   : > { %v1215_v7 = vmul.f32 %v3101_v40, %v1167_v9  ;;  %v1214_v4 = vmul.f32 %v3077_v27, %v1167_v9  ;;  %v1199_v41 = vmul.f32 %v3010_v45, %v1159_v39 }
 0x39e   : > { %1564 = vperm.xlu2 %2277, %v1189_v58  }
 0x39f   : > { %1288 = vperm.xlu0 %2278, %v1212_v51   ;;  %1283 = vperm.xlu1 %2276, %v1210_v10  }
 0x3a6   : > { %1579 = vperm.xlu2 %2277, %v1195_v6  }
 0x3a7   : > { %1599 = vperm.xlu0 %2278, %v1203_v46   ;;  %1594 = vperm.xlu1 %2276, %v1201_v59   ;;  %v2355_v46 = vld [vmem:[%s2676_s5 + $0xa8] sm:$0xff] }
 0x3ae   : > { %1258 = vperm.xlu2 %2277, %v1200_v49  }
 0x3af   : > { %1614 = vperm.xlu0 %2278, %v1209_v33   ;;  %1609 = vperm.xlu1 %2276, %v1207_v8   ;;  %v2356_v8 = vld [vmem:[%s2676_s5 + $0x60] sm:$0xff] }
 0x3b6   : > { %1263 = vperm.xlu2 %2277, %v1202_v43   ;;  %v2357_v43 = vld [vmem:[%s2676_s5 + $0x68] sm:$0xff] }
 0x3b7   : > { %1624 = vperm.xlu0 %2278, %v1213_v25   ;;  %1629 = vperm.xlu1 %2276, %v1215_v7  }
 0x3be   : > { %1278 = vperm.xlu2 %2277, %v1208_v17  }
 0x3c6   : > { %1293 = vperm.xlu2 %2277, %v1214_v4  }
 0x3c8   : > { %v3209_v53 = vpop.permute.xlu2 %1218 }
 0x3c9   : > { %v1296_v54 = vmul.f32 %v2348_v48, %v3209_v53  ;;  %v1297_v29 = vmul.f32 %v2349_v3, %v3209_v53  ;;  %v1956_v51 = vperm.slane %v3209_v53, %v2833_v26 }
 0x3cb   : > { %v1328_v40 = vrot.slane %v1296_v54, 4  ;;  %v1334_v31 = vrot.slane %v1297_v29, 4 }
 0x3cd   : > { %v1329_v13 = vadd.f32 %v1328_v40, %v1296_v54  ;;  %v1335_v14 = vadd.f32 %v1334_v31, %v1297_v29  ;;  %v2358_v29 = vld [vmem:[%s2676_s5 + $0xe0] sm:$0xff] }
 0x3ce   : > { %1604 = vperm.xlu2 %2277, %v1205_v37   ;;  %v2359_v37 = vld [vmem:[%s2676_s5 + $0xe8] sm:$0xff] }
 0x3cf   : > { %v1330_v15 = vrot.slane %v1329_v13, 2  ;;  %v1336_v56 = vrot.slane %v1335_v14, 2 }
 0x3d0   : > { %v3216_v34 = vpop.permute.xlu2 %1223 }
 0x3d1   : > { %v1298_v27 = vmul.f32 %v2350_v5, %v3216_v34  ;;  %v1299_v42 = vmul.f32 %v2351_v19, %v3216_v34  ;;  %v1331_v21 = vadd.f32 %v1330_v15, %v1329_v13  ;;  %v1337_v0 = vadd.f32 %v1336_v56, %v1335_v14 }
 0x3d2   : > { %v1959_v45 = vperm.slane %v3216_v34, %v2833_v26 }
 0x3d3   : > { %v1340_v11 = vrot.slane %v1298_v27, 4  ;;  %v1346_v60 = vrot.slane %v1299_v42, 4  ;;  %v1332_v47 = vrot.slane %v1331_v21, 1  ;;  %v1338_v35 = vrot.slane %v1337_v0, 1 }
 0x3d5   : > { %v1341_v16 = vadd.f32 %v1340_v11, %v1298_v27  ;;  %v1347_v24 = vadd.f32 %v1346_v60, %v1299_v42  ;;  %v3232_v58 = vadd.f32 %v1332_v47, %v1331_v21  ;;  %v3248_v49 = vadd.f32 %v1338_v35, %v1337_v0  ;;  %v2361_v47 = vld [vmem:[%s2676_s5 + $0x18] sm:$0xff] }
 0x3d6   : > { %1619 = vperm.xlu2 %2277, %v1211_v2  }
 0x3d7   : > { %v1342_v18 = vrot.slane %v1341_v16, 2  ;;  %v1348_v22 = vrot.slane %v1347_v24, 2 }
 0x3d8   : > { %v3223_v12 = vpop.permute.xlu2 %1228 }
 0x3d9   : > { %v1300_v50 = vmul.f32 %v2352_v23, %v3223_v12  ;;  %v1301_v57 = vmul.f32 %v2353_v52, %v3223_v12  ;;  %v1343_v30 = vadd.f32 %v1342_v18, %v1341_v16  ;;  %v1349_v55 = vadd.f32 %v1348_v22, %v1347_v24 }
 0x3da   : > { %v1962_v33 = vperm.slane %v3223_v12, %v2833_v26 }
 0x3db   : > { %v1352_v32 = vrot.slane %v1300_v50, 4  ;;  %v1358_v20 = vrot.slane %v1301_v57, 4  ;;  %v1344_v10 = vrot.slane %v1343_v30, 1  ;;  %v1350_v5 = vrot.slane %v1349_v55, 1 }
 0x3dd   : > { %v1353_v62 = vadd.f32 %v1352_v32, %v1300_v50  ;;  %v1359_v1 = vadd.f32 %v1358_v20, %v1301_v57  ;;  %v3260_v13 = vadd.f32 %v1344_v10, %v1343_v30  ;;  %v2360_v32 = vld [vmem:[%s2676_s5 + $0x10] sm:$0xff]  ;;  %v3266_v35 = vadd.f32 %v1350_v5, %v1349_v55 }
 0x3de   : > { %1589 = vperm.xlu2 %2277, %v1199_v41  }
 0x3df   : > { %v1354_v38 = vrot.slane %v1353_v62, 2  ;;  %v1360_v63 = vrot.slane %v1359_v1, 2 }
 0x3e0   : > { %v3238_v44 = vpop.permute.xlu1 %1243  ;;  %v3240_v39 = vpop.permute.xlu2 %1233 }
 0x3e1   : > { %v1306_v6 = vmul.f32 %v2354_v36, %v3238_v44  ;;  %v1307_v59 = vmul.f32 %v2355_v46, %v3238_v44  ;;  %v3246_v61 = vpop.permute.xlu0 %1253  ;;  %v1302_v9 = vmul.f32 %v2356_v8, %v3240_v39  ;;  %v1303_v25 = vmul.f32 %v2357_v43, %v3240_v39 }
 0x3e2   : > { %v1355_v7 = vadd.f32 %v1354_v38, %v1353_v62  ;;  %v1361_v17 = vadd.f32 %v1360_v63, %v1359_v1  ;;  %v1310_v40 = vmul.f32 %v2358_v29, %v3246_v61  ;;  %v1311_v31 = vmul.f32 %v2359_v37, %v3246_v61 }
 0x3e3   : > { %v1388_v4 = vrot.slane %v1306_v6, 4  ;;  %v1394_v48 = vrot.slane %v1307_v59, 4  ;;  %v1364_v54 = vrot.slane %v1302_v9, 4  ;;  %v1370_v3 = vrot.slane %v1303_v25, 4 }
 0x3e4   : > { %v1412_v11 = vrot.slane %v1310_v40, 4  ;;  %v1418_v15 = vrot.slane %v1311_v31, 4  ;;  %v1356_v2 = vrot.slane %v1355_v7, 1  ;;  %v1362_v16 = vrot.slane %v1361_v17, 1 }
 0x3e5   : > { %v1389_v27 = vadd.f32 %v1388_v4, %v1306_v6  ;;  %v1395_v19 = vadd.f32 %v1394_v48, %v1307_v59  ;;  %v1365_v42 = vadd.f32 %v1364_v54, %v1302_v9  ;;  %v1371_v14 = vadd.f32 %v1370_v3, %v1303_v25 }
 0x3e6   : > { %v1413_v24 = vadd.f32 %v1412_v11, %v1310_v40  ;;  %v1419_v23 = vadd.f32 %v1418_v15, %v1311_v31  ;;  %v1971_v38 = vperm.slane %v3238_v44, %v2833_v26  ;;  %v1965_v59 = vperm.slane %v3240_v39, %v2833_v26 }
 0x3e7   : > { %v1390_v60 = vrot.slane %v1389_v27, 2  ;;  %v1396_v56 = vrot.slane %v1395_v19, 2  ;;  %v1366_v21 = vrot.slane %v1365_v42, 2  ;;  %v1372_v18 = vrot.slane %v1371_v14, 2 }
 0x3e8   : > { %v1555_v50 = vpop.permute.xlu1 %1554  ;;  %v3262_v52 = vpop.permute.xlu2 %1238  ;;  %v1414_v62 = vrot.slane %v1413_v24, 2  ;;  %v1420_v1 = vrot.slane %v1419_v23, 2  ;;  %v3272_v8 = vadd.f32 %v1356_v2, %v1355_v7  ;;  %v3274_v9 = vadd.f32 %v1362_v16, %v1361_v17  ;;  %v2362_v7 = vld [vmem:[%s2676_s5 + $0x80] sm:$0xff] }
 0x3e9   : > { %v1391_v57 = vadd.f32 %v1390_v60, %v1389_v27  ;;  %v1397_v0 = vadd.f32 %v1396_v56, %v1395_v19  ;;  %v1632_v20 = vmul.f32 %v2360_v32, %v1555_v50  ;;  %v1633_v41 = vmul.f32 %v2361_v47, %v1555_v50  ;;  %v1560_v37 = vpop.permute.xlu0 %1559  ;;  %v2363_v19 = vld [vmem:[%s2676_s5 + $0x88] sm:$0xff] }
 0x3ea   : > { %v1367_v30 = vadd.f32 %v1366_v21, %v1365_v42  ;;  %v1373_v22 = vadd.f32 %v1372_v18, %v1371_v14  ;;  %v3276_v4 = vadd.f32 %v1414_v62, %v1413_v24  ;;  %v3278_v48 = vadd.f32 %v1420_v1, %v1419_v23  ;;  %v2364_v21 = vld [vmem:[%s2676_s5 + $0x30] sm:$0xff]  ;;  %v2365_v24 = vld [vmem:[%s2676_s5 + $0x38] sm:$0xff] }
 0x3eb   : > { %v1664_v63 = vrot.slane %v1632_v20, 4  ;;  %v1670_v10 = vrot.slane %v1633_v41, 4  ;;  %v1392_v36 = vrot.slane %v1391_v57, 1  ;;  %v1398_v6 = vrot.slane %v1397_v0, 1 }
 0x3ec   : > { %v1368_v46 = vrot.slane %v1367_v30, 1  ;;  %v1374_v25 = vrot.slane %v1373_v22, 1  ;;  %v1957_v40 = vperm.slane %v1555_v50, %v2838_v28  ;;  %v1304_v17 = vmul.f32 %v2362_v7, %v3262_v52 }
 0x3ed   : > { %v1665_v43 = vadd.f32 %v1664_v63, %v1632_v20  ;;  %v1671_v55 = vadd.f32 %v1670_v10, %v1633_v41  ;;  %v3285_v31 = vadd.f32 %v1392_v36, %v1391_v57  ;;  %v3287_v5 = vadd.f32 %v1398_v6, %v1397_v0  ;;  %v2366_v20 = vld [vmem:[%s2676_s5 + $0x70] sm:$0xff] }
 0x3ee   : > { %v3289_v27 = vadd.f32 %v1368_v46, %v1367_v30  ;;  %v1305_v42 = vmul.f32 %v2363_v19, %v3262_v52  ;;  %v1958_v16 = vsel %vm743_vm0, %v1957_v40, %v1956_v51  ;;  %v1376_v60 = vrot.slane %v1304_v17, 4 }
 0x3ef   : > { %v1666_v3 = vrot.slane %v1665_v43, 2  ;;  %v1672_v29 = vrot.slane %v1671_v55, 2  ;;  %v1634_v18 = vmul.f32 %v2364_v21, %v1560_v37  ;;  %v1635_v23 = vmul.f32 %v2365_v24, %v1560_v37 }
 0x3f0   : > { %v3293_v14 = vpop.permute.xlu1 %1569  ;;  %v3295_v11 = vpop.permute.xlu2 %1248  ;;  %v1382_v56 = vrot.slane %v1305_v42, 4  ;;  %v1960_v50 = vperm.slane %v1560_v37, %v2838_v28  ;;  %v1377_v32 = vadd.f32 %v1376_v60, %v1304_v17  ;;  %v3310_v62 = vadd.f32 %v1374_v25, %v1373_v22 }
 0x3f1   : > { %v1667_v15 = vadd.f32 %v1666_v3, %v1665_v43  ;;  %v1673_v2 = vadd.f32 %v1672_v29, %v1671_v55  ;;  %v1638_v47 = vmul.f32 %v2366_v20, %v3293_v14  ;;  %v1676_v30 = vrot.slane %v1634_v18, 4  ;;  %v2367_v43 = vld [vmem:[%s2676_s5 + $0x78] sm:$0xff] }
 0x3f2   : > { %v1383_v41 = vadd.f32 %v1382_v56, %v1305_v42  ;;  %v1682_v53 = vrot.slane %v1635_v23, 4  ;;  %v1961_v51 = vsel %vm743_vm0, %v1960_v50, %v1959_v45  ;;  %v1378_v63 = vrot.slane %v1377_v32, 2  ;;  %v2368_v42 = vld [vmem:[%s2676_s5 + $0xc0] sm:$0xff]  ;;  %v2369_v50 = vld [vmem:[%s2676_s5 + $0xc8] sm:$0xff] }
 0x3f3   : > { %v1668_v57 = vrot.slane %v1667_v15, 1  ;;  %v1674_v0 = vrot.slane %v1673_v2, 1  ;;  %v3313_v10 = vsel %vm790_vm1, %v1961_v51, %v1958_v16  ;;  %v1677_v6 = vadd.f32 %v1676_v30, %v1634_v18 }
 0x3f4   : > { %v1384_v36 = vrot.slane %v1383_v41, 2  ;;  %v1683_v46 = vadd.f32 %v1682_v53, %v1635_v23  ;;  %v1639_v55 = vmul.f32 %v2367_v43, %v3293_v14  ;;  %v1379_v34 = vadd.f32 %v1378_v63, %v1377_v32 }
 0x3f5   : > { %v1669_v1 = vadd.f32 %v1668_v57, %v1667_v15  ;;  %v1675_v29 = vadd.f32 %v1674_v0, %v1673_v2  ;;  %v1700_v40 = vrot.slane %v1638_v47, 4  ;;  %v1678_v22 = vrot.slane %v1677_v6, 2  ;;  %v1575_v0 = vpop.permute.xlu0 %1574 }
 0x3f6   : > { %v1684_v25 = vrot.slane %v1683_v46, 2  ;;  %v1706_v7 = vrot.slane %v1639_v55, 4  ;;  %v1385_v17 = vadd.f32 %v1384_v36, %v1383_v41  ;;  %v1968_v37 = vperm.slane %v3262_v52, %v2833_v26  ;;  %v2370_v36 = vld [vmem:[%s2676_s5 + $0x90] sm:$0xff] }
 0x3f7   : > { %v1701_v19 = vadd.f32 %v1700_v40, %v1638_v47  ;;  %v1308_v15 = vmul.f32 %v2368_v42, %v3295_v11  ;;  %v1856_v16 = vadd.f32 %v1669_v1, %v3232_v58  ;;  %v1679_v60 = vadd.f32 %v1678_v22, %v1677_v6  ;;  %v2376_v52 = vld [vmem:[%s2676_s5 + $0xb0] sm:$0xff] }
 0x3f8   : > { %v1685_v2 = vadd.f32 %v1684_v25, %v1683_v46  ;;  %v1707_v56 = vadd.f32 %v1706_v7, %v1639_v55  ;;  %v3324_v21 = vpop.permute.xlu2 %1564  ;;  %v1857_v18 = vadd.f32 %v1675_v29, %v3248_v49  ;;  %v1380_v24 = vrot.slane %v1379_v34, 1  ;;  %v2371_v29 = vld [vmem:[%s2676_s5 + $0x98] sm:$0xff] }
 0x3f9   : > { %v1702_v23 = vrot.slane %v1701_v19, 2  ;;  %v1309_v57 = vmul.f32 %v2369_v50, %v3295_v11  ;;  %v1680_v32 = vrot.slane %v1679_v60, 1  ;;  %v1966_v58 = vperm.slane %v3293_v14, %v2838_v28 }
 0x3fa   : > { %v1686_v20 = vrot.slane %v1685_v2, 1  ;;  %v1708_v47 = vrot.slane %v1707_v56, 2  ;;  %v1386_v41 = vrot.slane %v1385_v17, 1  ;;  %v1400_v53 = vrot.slane %v1308_v15, 4 }
 0x3fb   : > { %v1703_v30 = vadd.f32 %v1702_v23, %v1701_v19  ;;  %v1406_v51 = vrot.slane %v1309_v57, 4  ;;  %v1681_v1 = vadd.f32 %v1680_v32, %v1679_v60  ;;  %v1640_v6 = vmul.f32 %v2370_v36, %v1575_v0 }
 0x3fc   : > { %v1687_v49 = vadd.f32 %v1686_v20, %v1685_v2  ;;  %v1709_v63 = vadd.f32 %v1708_v47, %v1707_v56  ;;  %v1401_v43 = vadd.f32 %v1400_v53, %v1308_v15  ;;  %v1641_v40 = vmul.f32 %v2371_v29, %v1575_v0  ;;  %v3335_v2 = vpop.permute.xlu1 %1584  ;;  %v2374_v29 = vld [vmem:[%s2676_s5 + $0x50] sm:$0xff] }
 0x3fd   : > { %v1704_v46 = vrot.slane %v1703_v30, 1  ;;  %v1407_v55 = vadd.f32 %v1406_v51, %v1309_v57  ;;  %v1858_v22 = vadd.f32 %v1681_v1, %v3260_v13  ;;  %v1712_v14 = vrot.slane %v1640_v6, 4 }
 0x3fe   : > { %v1859_v25 = vadd.f32 %v1687_v49, %v3266_v35  ;;  %v1710_v7 = vrot.slane %v1709_v63, 1  ;;  %v1402_v19 = vrot.slane %v1401_v43, 2  ;;  %v1718_v60 = vrot.slane %v1641_v40, 4  ;;  %v2373_v49 = vld [vmem:[%s2676_s5 + $0xd8] sm:$0xff] }
 0x3ff   : > { %v1705_v42 = vadd.f32 %v1704_v46, %v1703_v30  ;;  %v1408_v23 = vrot.slane %v1407_v55, 2  ;;  %v3338_v56 = vsel %vm790_vm1, %v1858_v22, %v1856_v16  ;;  %v1713_v13 = vadd.f32 %v1712_v14, %v1640_v6  ;;  %v2372_v16 = vld [vmem:[%s2676_s5 + $0xd0] sm:$0xff]  ;;  %v2375_v22 = vld [vmem:[%s2676_s5 + $0x58] sm:$0xff] }
 0x400   : > { %v3341_v15 = vsel %vm790_vm1, %v1859_v25, %v1857_v18  ;;  %v1711_v50 = vadd.f32 %v1710_v7, %v1709_v63  ;;  %v1381_v57 = vadd.f32 %v1380_v24, %v1379_v34  ;;  %v1403_v35 = vadd.f32 %v1402_v19, %v1401_v43  ;;  %v1580_v18 = vpop.permute.xlu2 %1579 }
 0x401   : > { %v1409_v32 = vadd.f32 %v1408_v23, %v1407_v55  ;;  %v1719_v20 = vadd.f32 %v1718_v60, %v1641_v40  ;;  %v1967_v47 = vsel %vm743_vm0, %v1966_v58, %v1965_v59  ;;  %v1714_v30 = vrot.slane %v1713_v13, 2 }
 0x402   : > { %v1969_v53 = vperm.slane %v1575_v0, %v2838_v28  ;;  %v1644_v51 = vmul.f32 %v2372_v16, %v3335_v2  ;;  %v1387_v1 = vadd.f32 %v1386_v41, %v1385_v17  ;;  %v1974_v34 = vperm.slane %v3295_v11, %v2833_v26  ;;  %v2382_v11 = vld [vmem:[%s2676_s5 + $0x160] sm:$0xff] }
 0x403   : > { %v1720_v24 = vrot.slane %v1719_v20, 2  ;;  %v1645_v63 = vmul.f32 %v2373_v49, %v3335_v2  ;;  %v3355_v39 = vadd.f32 %v1705_v42, %v3289_v27  ;;  %v3358_v59 = vadd.f32 %v1711_v50, %v3310_v62 }
 0x404   : > { %v1715_v0 = vadd.f32 %v1714_v30, %v1713_v13  ;;  %v1736_v58 = vrot.slane %v1644_v51, 4  ;;  %v1404_v36 = vrot.slane %v1403_v35, 1  ;;  %v1410_v6 = vrot.slane %v1409_v32, 1 }
 0x405   : > { %v1721_v17 = vadd.f32 %v1720_v24, %v1719_v20  ;;  %v1742_v41 = vrot.slane %v1645_v63, 4  ;;  %v1970_v43 = vsel %vm743_vm0, %v1969_v53, %v1968_v37  ;;  %v1636_v27 = vmul.f32 %v2374_v29, %v3324_v21 }
 0x406   : > { %v1716_v46 = vrot.slane %v1715_v0, 1  ;;  %v1737_v55 = vadd.f32 %v1736_v58, %v1644_v51  ;;  %v1975_v62 = vperm.slane %v3335_v2, %v2838_v28  ;;  %v1637_v25 = vmul.f32 %v2375_v22, %v3324_v21  ;;  %v2377_v58 = vld [vmem:[%s2676_s5 + $0xb8] sm:$0xff] }
 0x407   : > { %v1743_v40 = vadd.f32 %v1742_v41, %v1645_v63  ;;  %v1963_v7 = vperm.slane %v3324_v21, %v2838_v28  ;;  %v1722_v14 = vrot.slane %v1721_v17, 1  ;;  %v1688_v19 = vrot.slane %v1636_v27, 4 }
 0x408   : > { %v1738_v42 = vrot.slane %v1737_v55, 2  ;;  %v1642_v37 = vmul.f32 %v2376_v52, %v1580_v18  ;;  %v3373_v23 = vadd.f32 %v1404_v36, %v1403_v35  ;;  %v1694_v50 = vrot.slane %v1637_v25, 4  ;;  %v3385_v41 = vpop.permute.xlu2 %1258  ;;  %v2379_v52 = vld [vmem:[%s2676_s5 + $0x108] sm:$0xff] }
 0x409   : > { %v1744_v60 = vrot.slane %v1743_v40, 2  ;;  %v1964_v13 = vsel %vm743_vm0, %v1963_v7, %v1962_v33  ;;  %v1717_v20 = vadd.f32 %v1716_v46, %v1715_v0  ;;  %v1689_v53 = vadd.f32 %v1688_v19, %v1636_v27 }
 0x40a   : > { %v1739_v30 = vadd.f32 %v1738_v42, %v1737_v55  ;;  %v2005_v21 = vsel %vm792_vm2, %v1964_v13, %v3313_v10  ;;  %v3381_v16 = vadd.f32 %v1410_v6, %v1409_v32  ;;  %v1695_v24 = vadd.f32 %v1694_v50, %v1637_v25 }
 0x40b   : > { %v1745_v51 = vadd.f32 %v1744_v60, %v1743_v40  ;;  %v2006_v35 = vsel %vm794_vm3, %v1967_v47, %v2005_v21  ;;  %v1723_v49 = vadd.f32 %v1722_v14, %v1721_v17  ;;  %v1690_v63 = vrot.slane %v1689_v53, 2  ;;  %v2378_v40 = vld [vmem:[%s2676_s5 + $0x100] sm:$0xff] }
 0x40c   : > { %v1643_v36 = vmul.f32 %v2377_v58, %v1580_v18  ;;  %v1724_v12 = vrot.slane %v1642_v37, 4  ;;  %v1740_v33 = vrot.slane %v1739_v30, 1  ;;  %v1696_v0 = vrot.slane %v1695_v24, 2 }
 0x40d   : > { %v1972_v46 = vperm.slane %v1580_v18, %v2838_v28  ;;  %v2007_v10 = vsel %vm796_vm4, %v1970_v43, %v2006_v35  ;;  %v1864_v32 = vadd.f32 %v1717_v20, %v1381_v57  ;;  %v1691_v6 = vadd.f32 %v1690_v63, %v1689_v53  ;;  %v3395_v57 = vpop.permute.xlu1 %1268  ;;  %v2380_v53 = vld [vmem:[%s2676_s5 + $0x140] sm:$0xff] }
 0x40e   : > { %v1725_v55 = vadd.f32 %v1724_v12, %v1642_v37  ;;  %v1730_v29 = vrot.slane %v1643_v36, 4  ;;  %v1746_v47 = vrot.slane %v1745_v51, 1  ;;  %v1697_v17 = vadd.f32 %v1696_v0, %v1695_v24 }
 0x40f   : > { %v1973_v27 = vsel %vm743_vm0, %v1972_v46, %v1971_v38  ;;  %v1312_v22 = vmul.f32 %v2378_v40, %v3385_v41  ;;  %v1865_v25 = vadd.f32 %v1723_v49, %v1387_v1  ;;  %v1692_v7 = vrot.slane %v1691_v6, 1 }
 0x410   : > { %v1726_v18 = vrot.slane %v1725_v55, 2  ;;  %v1731_v43 = vadd.f32 %v1730_v29, %v1643_v36  ;;  %v1741_v14 = vadd.f32 %v1740_v33, %v1739_v30  ;;  %v1698_v42 = vrot.slane %v1697_v17, 1  ;;  %v2381_v36 = vld [vmem:[%s2676_s5 + $0x148] sm:$0xff] }
 0x411   : > { %v3398_v19 = vsel %vm798_vm5, %v1973_v27, %v2007_v10  ;;  %v1313_v44 = vmul.f32 %v2379_v52, %v3385_v41  ;;  %v1693_v38 = vadd.f32 %v1692_v7, %v1691_v6  ;;  %v1424_v50 = vrot.slane %v1312_v22, 4  ;;  %v3410_v6 = vpop.permute.xlu0 %1273  ;;  %v2383_v52 = vld [vmem:[%s2676_s5 + $0x168] sm:$0xff] }
 0x412   : > { %v1727_v37 = vadd.f32 %v1726_v18, %v1725_v55  ;;  %v1732_v60 = vrot.slane %v1731_v43, 2  ;;  %v1747_v1 = vadd.f32 %v1746_v47, %v1745_v51  ;;  %v1699_v13 = vadd.f32 %v1698_v42, %v1697_v17 }
 0x413   : > { %v1430_v20 = vrot.slane %v1313_v44, 4  ;;  %v1316_v21 = vmul.f32 %v2380_v53, %v3395_v57  ;;  %v1860_v30 = vadd.f32 %v1693_v38, %v3272_v8  ;;  %v1425_v49 = vadd.f32 %v1424_v50, %v1312_v22 }
 0x414   : > { %v1728_v24 = vrot.slane %v1727_v37, 1  ;;  %v1733_v35 = vadd.f32 %v1732_v60, %v1731_v43  ;;  %v1861_v63 = vadd.f32 %v1699_v13, %v3274_v9  ;;  %v1317_v12 = vmul.f32 %v2381_v36, %v3395_v57 }
 0x415   : > { %v1431_v58 = vadd.f32 %v1430_v20, %v1313_v44  ;;  %v1448_v33 = vrot.slane %v1316_v21, 4  ;;  %v1921_v51 = vsel %vm792_vm2, %v1860_v30, %v3338_v56  ;;  %v1426_v10 = vrot.slane %v1425_v49, 2  ;;  %v2385_v20 = vld [vmem:[%s2676_s5 + $0x128] sm:$0xff] }
 0x416   : > { %v1729_v0 = vadd.f32 %v1728_v24, %v1727_v37  ;;  %v1734_v46 = vrot.slane %v1733_v35, 1  ;;  %v1922_v8 = vsel %vm794_vm3, %v3355_v39, %v1921_v51  ;;  %v1928_v55 = vsel %vm792_vm2, %v1861_v63, %v3341_v15 }
 0x417   : > { %v1432_v9 = vrot.slane %v1431_v58, 2  ;;  %v1449_v29 = vadd.f32 %v1448_v33, %v1316_v21  ;;  %v1929_v47 = vsel %vm794_vm3, %v3358_v59, %v1928_v55  ;;  %v1923_v27 = vsel %vm796_vm4, %v1864_v32, %v1922_v8 }
 0x418   : > { %v1735_v17 = vadd.f32 %v1734_v46, %v1733_v35  ;;  %v1866_v56 = vadd.f32 %v1729_v0, %v3285_v31  ;;  %v1930_v40 = vsel %vm796_vm4, %v1865_v25, %v1929_v47  ;;  %v1427_v22 = vadd.f32 %v1426_v10, %v1425_v49  ;;  %v2386_v35 = vld [vmem:[%s2676_s5 + $0x1a0] sm:$0xff]  ;;  %v2387_v46 = vld [vmem:[%s2676_s5 + $0x1a8] sm:$0xff] }
 0x419   : > { %v1433_v7 = vadd.f32 %v1432_v9, %v1431_v58  ;;  %v1450_v39 = vrot.slane %v1449_v29, 2  ;;  %v3428_v15 = vsel %vm743_vm0, %v1975_v62, %v1974_v34  ;;  %v1454_v32 = vrot.slane %v1317_v12, 4  ;;  %v3442_v34 = vpop.permute.xlu2 %1263  ;;  %v3465_v33 = vpop.permute.xlu0 %1288 }
 0x41a   : > { %v1867_v59 = vadd.f32 %v1735_v17, %v3287_v5  ;;  %v3432_v31 = vsel %vm798_vm5, %v1866_v56, %v1923_v27  ;;  %v3435_v25 = vadd.f32 %v1741_v14, %v3373_v23  ;;  %v3438_v18 = vadd.f32 %v1747_v1, %v3381_v16  ;;  %v3449_v14 = vpop.permute.xlu1 %1283  ;;  %v2384_v1 = vld [vmem:[%s2676_s5 + $0x120] sm:$0xff] }
 0x41b   : > { %v1428_v43 = vrot.slane %v1427_v22, 1  ;;  %v1318_v2 = vmul.f32 %v2382_v11, %v3410_v6  ;;  %v1451_v62 = vadd.f32 %v1450_v39, %v1449_v29  ;;  %v1455_v42 = vadd.f32 %v1454_v32, %v1317_v12 }
 0x41c   : > { %v3445_v5 = vsel %vm798_vm5, %v1867_v59, %v1930_v40  ;;  %v1319_v23 = vmul.f32 %v2383_v52, %v3410_v6  ;;  %v1434_v16 = vrot.slane %v1433_v7, 1  ;;  %v1980_v44 = vperm.slane %v3385_v41, %v2833_v26  ;;  %v2388_v40 = vld [vmem:[%s2676_s5 + $0x1c0] sm:$0xff] }
 0x41d   : > { %v1986_v38 = vperm.slane %v3395_v57, %v2833_v26  ;;  %v1460_v37 = vrot.slane %v1318_v2, 4  ;;  %v1456_v60 = vrot.slane %v1455_v42, 2  ;;  %v1314_v13 = vmul.f32 %v2384_v1, %v3442_v34 }
 0x41e   : > { %v1466_v50 = vrot.slane %v1319_v23, 4  ;;  %v1315_v53 = vmul.f32 %v2385_v20, %v3442_v34  ;;  %v3459_v21 = vadd.f32 %v1428_v43, %v1427_v22  ;;  %v1989_v24 = vperm.slane %v3410_v6, %v2833_v26 }
 0x41f   : > { %v1461_v30 = vadd.f32 %v1460_v37, %v1318_v2  ;;  %v1322_v49 = vmul.f32 %v2386_v35, %v3449_v14  ;;  %v1452_v63 = vrot.slane %v1451_v62, 1  ;;  %v1436_v36 = vrot.slane %v1314_v13, 4 }
 0x420   : > { %v1467_v58 = vadd.f32 %v1466_v50, %v1319_v23  ;;  %v1442_v12 = vrot.slane %v1315_v53, 4  ;;  %v1457_v51 = vadd.f32 %v1456_v60, %v1455_v42  ;;  %v1323_v10 = vmul.f32 %v2387_v46, %v3449_v14 }
 0x421   : > { %v1462_v0 = vrot.slane %v1461_v30, 2  ;;  %v1484_v8 = vrot.slane %v1322_v49, 4  ;;  %v3469_v55 = vadd.f32 %v1434_v16, %v1433_v7  ;;  %v1437_v29 = vadd.f32 %v1436_v36, %v1314_v13  ;;  %v2389_v7 = vld [vmem:[%s2676_s5 + $0x1c8] sm:$0xff]  ;;  %v3477_v50 = vpop.permute.xlu2 %1278 }
 0x422   : > { %v1468_v9 = vrot.slane %v1467_v58, 2  ;;  %v1443_v47 = vadd.f32 %v1442_v12, %v1315_v53  ;;  %v1490_v27 = vrot.slane %v1323_v10, 4  ;;  %v1324_v22 = vmul.f32 %v2388_v40, %v3465_v33 }
 0x423   : > { %v1463_v17 = vadd.f32 %v1462_v0, %v1461_v30  ;;  %v1485_v56 = vadd.f32 %v1484_v8, %v1322_v49  ;;  %v3473_v39 = vadd.f32 %v1452_v63, %v1451_v62  ;;  %v1438_v32 = vrot.slane %v1437_v29, 2  ;;  %v1595_v0 = vpop.permute.xlu1 %1594 }
 0x424   : > { %v1469_v59 = vadd.f32 %v1468_v9, %v1467_v58  ;;  %v1444_v43 = vrot.slane %v1443_v47, 2  ;;  %v1458_v11 = vrot.slane %v1457_v51, 1  ;;  %v1491_v42 = vadd.f32 %v1490_v27, %v1323_v10  ;;  %v2390_v9 = vld [vmem:[%s2676_s5 + $0x180] sm:$0xff]  ;;  %v2391_v27 = vld [vmem:[%s2676_s5 + $0x188] sm:$0xff] }
 0x425   : > { %v1486_v2 = vrot.slane %v1485_v56, 2  ;;  %v1325_v52 = vmul.f32 %v2389_v7, %v3465_v33  ;;  %v1464_v23 = vrot.slane %v1463_v17, 1  ;;  %v1439_v16 = vadd.f32 %v1438_v32, %v1437_v29 }
 0x426   : > { %v1445_v37 = vadd.f32 %v1444_v43, %v1443_v47  ;;  %v1496_v60 = vrot.slane %v1324_v22, 4  ;;  %v1470_v1 = vrot.slane %v1469_v59, 1  ;;  %v1492_v62 = vrot.slane %v1491_v42, 2  ;;  %v2392_v43 = vld [vmem:[%s2676_s5 + $0x110] sm:$0xff] }
 0x427   : > { %v1487_v13 = vadd.f32 %v1486_v2, %v1485_v56  ;;  %v1502_v20 = vrot.slane %v1325_v52, 4  ;;  %v1440_v53 = vrot.slane %v1439_v16, 1  ;;  %v1983_v30 = vperm.slane %v3442_v34, %v2833_v26  ;;  %v1600_v2 = vpop.permute.xlu0 %1599 }
 0x428   : > { %v1497_v49 = vadd.f32 %v1496_v60, %v1324_v22  ;;  %v3483_v63 = vadd.f32 %v1458_v11, %v1457_v51  ;;  %v1446_v58 = vrot.slane %v1445_v37, 1  ;;  %v1493_v36 = vadd.f32 %v1492_v62, %v1491_v42 }
 0x429   : > { %v1503_v12 = vadd.f32 %v1502_v20, %v1325_v52  ;;  %v3485_v46 = vadd.f32 %v1464_v23, %v1463_v17  ;;  %v1488_v10 = vrot.slane %v1487_v13, 1  ;;  %v1320_v29 = vmul.f32 %v2390_v9, %v3477_v50  ;;  %v2393_v52 = vld [vmem:[%s2676_s5 + $0x118] sm:$0xff] }
 0x42a   : > { %v1498_v8 = vrot.slane %v1497_v49, 2  ;;  %v3489_v47 = vadd.f32 %v1470_v1, %v1469_v59  ;;  %v1321_v40 = vmul.f32 %v2391_v27, %v3477_v50  ;;  %v3495_v22 = vadd.f32 %v1440_v53, %v1439_v16  ;;  %v2394_v27 = vld [vmem:[%s2676_s5 + $0x130] sm:$0xff] }
 0x42b   : > { %v1504_v56 = vrot.slane %v1503_v12, 2  ;;  %v1494_v32 = vrot.slane %v1493_v36, 1  ;;  %v1472_v17 = vrot.slane %v1320_v29, 4  ;;  %v1648_v11 = vmul.f32 %v2392_v43, %v1595_v0  ;;  %v1610_v41 = vpop.permute.xlu1 %1609 }
 0x42c   : > { %v3498_v42 = vadd.f32 %v1446_v58, %v1445_v37  ;;  %v1499_v7 = vadd.f32 %v1498_v8, %v1497_v49  ;;  %v1478_v59 = vrot.slane %v1321_v40, 4  ;;  %v1649_v23 = vmul.f32 %v2393_v52, %v1595_v0 }
 0x42d   : > { %v3501_v60 = vadd.f32 %v1488_v10, %v1487_v13  ;;  %v1473_v1 = vadd.f32 %v1472_v17, %v1320_v29  ;;  %v1760_v62 = vrot.slane %v1648_v11, 4  ;;  %v1505_v20 = vadd.f32 %v1504_v56, %v1503_v12  ;;  %v3509_v13 = vpop.permute.xlu2 %1293  ;;  %v2395_v17 = vld [vmem:[%s2676_s5 + $0x138] sm:$0xff] }
 0x42e   : > { %v1479_v53 = vadd.f32 %v1478_v59, %v1321_v40  ;;  %v1766_v9 = vrot.slane %v1649_v23, 4  ;;  %v1650_v43 = vmul.f32 %v2394_v27, %v1600_v2  ;;  %v3506_v45 = vadd.f32 %v1494_v32, %v1493_v36  ;;  %v2396_v27 = vld [vmem:[%s2676_s5 + $0x1e0] sm:$0xff] }
 0x42f   : > { %v1474_v37 = vrot.slane %v1473_v1, 2  ;;  %v1761_v49 = vadd.f32 %v1760_v62, %v1648_v11  ;;  %v1981_v58 = vperm.slane %v1595_v0, %v2838_v28  ;;  %v1500_v10 = vrot.slane %v1499_v7, 1  ;;  %v3536_v51 = vpop.permute.xlu0 %1614 }
 0x430   : > { %v1480_v8 = vrot.slane %v1479_v53, 2  ;;  %v1767_v29 = vadd.f32 %v1766_v9, %v1649_v23  ;;  %v1651_v52 = vmul.f32 %v2395_v17, %v1600_v2  ;;  %v1772_v56 = vrot.slane %v1650_v43, 4 }
 0x431   : > { %v1475_v3 = vadd.f32 %v1474_v37, %v1473_v1  ;;  %v1762_v12 = vrot.slane %v1761_v49, 2  ;;  %v1984_v40 = vperm.slane %v1600_v2, %v2838_v28  ;;  %v1506_v59 = vrot.slane %v1505_v20, 1 }
 0x432   : > { %v1768_v36 = vrot.slane %v1767_v29, 2  ;;  %v1778_v32 = vrot.slane %v1651_v52, 4  ;;  %v1326_v11 = vmul.f32 %v2396_v27, %v3509_v13  ;;  %v1481_v0 = vadd.f32 %v1480_v8, %v1479_v53 }
 0x433   : > { %v1763_v62 = vadd.f32 %v1762_v12, %v1761_v49  ;;  %v1982_v23 = vsel %vm743_vm0, %v1981_v58, %v1980_v44  ;;  %v1773_v9 = vadd.f32 %v1772_v56, %v1650_v43  ;;  %v1476_v1 = vrot.slane %v1475_v3, 1  ;;  %v2397_v49 = vld [vmem:[%s2676_s5 + $0x1e8] sm:$0xff] }
 0x434   : > { %v1769_v37 = vadd.f32 %v1768_v36, %v1767_v29  ;;  %v1779_v17 = vadd.f32 %v1778_v32, %v1651_v52  ;;  %v1985_v2 = vsel %vm743_vm0, %v1984_v40, %v1983_v30  ;;  %v3523_v54 = vadd.f32 %v1500_v10, %v1499_v7  ;;  %v2398_v40 = vld [vmem:[%s2676_s5 + $0x170] sm:$0xff] }
 0x435   : > { %v1764_v35 = vrot.slane %v1763_v62, 1  ;;  %v1774_v53 = vrot.slane %v1773_v9, 2  ;;  %v1327_v8 = vmul.f32 %v2397_v49, %v3509_v13  ;;  %v3527_v12 = vadd.f32 %v1506_v59, %v1505_v20  ;;  %v2399_v59 = vld [vmem:[%s2676_s5 + $0x178] sm:$0xff] }
 0x436   : > { %v1770_v44 = vrot.slane %v1769_v37, 1  ;;  %v1780_v43 = vrot.slane %v1779_v17, 2  ;;  %v1508_v58 = vrot.slane %v1326_v11, 4  ;;  %v1482_v29 = vrot.slane %v1481_v0, 1 }
 0x437   : > { %v1775_v52 = vadd.f32 %v1774_v53, %v1773_v9  ;;  %v3530_v34 = vsel %vm790_vm1, %v1985_v2, %v1982_v23  ;;  %v1514_v30 = vrot.slane %v1327_v8, 4  ;;  %v3532_v7 = vadd.f32 %v1476_v1, %v1475_v3 }
 0x438   : > { %v1781_v10 = vadd.f32 %v1780_v43, %v1779_v17  ;;  %v1509_v56 = vadd.f32 %v1508_v58, %v1326_v11  ;;  %v1654_v36 = vmul.f32 %v2398_v40, %v1610_v41  ;;  %v1765_v32 = vadd.f32 %v1764_v35, %v1763_v62  ;;  %v2400_v62 = vld [vmem:[%s2676_s5 + $0x190] sm:$0xff] }
 0x439   : > { %v1776_v27 = vrot.slane %v1775_v52, 1  ;;  %v1515_v20 = vadd.f32 %v1514_v30, %v1327_v8  ;;  %v1655_v49 = vmul.f32 %v2399_v59, %v1610_v41  ;;  %v1771_v16 = vadd.f32 %v1770_v44, %v1769_v37  ;;  %v2401_v59 = vld [vmem:[%s2676_s5 + $0x198] sm:$0xff] }
 0x43a   : > { %v1782_v9 = vrot.slane %v1781_v10, 1  ;;  %v1510_v53 = vrot.slane %v1509_v56, 2  ;;  %v1796_v23 = vrot.slane %v1654_v36, 4  ;;  %v1990_v11 = vperm.slane %v1610_v41, %v2838_v28 }
 0x43b   : > { %v1777_v2 = vadd.f32 %v1776_v27, %v1775_v52  ;;  %v1516_v3 = vrot.slane %v1515_v20, 2  ;;  %v1802_v1 = vrot.slane %v1655_v49, 4  ;;  %v1656_v8 = vmul.f32 %v2400_v62, %v3536_v51 }
 0x43c   : > { %v1783_v17 = vadd.f32 %v1782_v9, %v1781_v10  ;;  %v1511_v43 = vadd.f32 %v1510_v53, %v1509_v56  ;;  %v1797_v35 = vadd.f32 %v1796_v23, %v1654_v36  ;;  %v1872_v58 = vadd.f32 %v1765_v32, %v3459_v21  ;;  %v2402_v23 = vld [vmem:[%s2676_s5 + $0x150] sm:$0xff] }
 0x43d   : > { %v1874_v30 = vadd.f32 %v1777_v2, %v3495_v22  ;;  %v1517_v37 = vadd.f32 %v1516_v3, %v1515_v20  ;;  %v1803_v44 = vadd.f32 %v1802_v1, %v1655_v49  ;;  %v3543_v40 = vadd.f32 %v1482_v29, %v1481_v0  ;;  %v1605_v22 = vpop.permute.xlu2 %1604  ;;  %v2403_v3 = vld [vmem:[%s2676_s5 + $0x158] sm:$0xff] }
 0x43e   : > { %v2001_v52 = vperm.slane %v3509_v13, %v2833_v26  ;;  %v1798_v27 = vrot.slane %v1797_v35, 2  ;;  %v1657_v41 = vmul.f32 %v2401_v59, %v3536_v51  ;;  %v1873_v10 = vadd.f32 %v1771_v16, %v3469_v55 }
 0x43f   : > { %v1875_v56 = vadd.f32 %v1783_v17, %v3498_v42  ;;  %v1804_v21 = vrot.slane %v1803_v44, 2  ;;  %v1808_v36 = vrot.slane %v1656_v8, 4  ;;  %v1512_v32 = vrot.slane %v1511_v43, 1  ;;  %v3560_v17 = vpop.permute.xlu1 %1629 }
 0x440   : > { %v1799_v20 = vadd.f32 %v1798_v27, %v1797_v35  ;;  %v1991_v0 = vsel %vm743_vm0, %v1990_v11, %v1989_v24  ;;  %v1814_v29 = vrot.slane %v1657_v41, 4  ;;  %v3556_v49 = vsel %vm790_vm1, %v1874_v30, %v1872_v58 }
 0x441   : > { %v1518_v9 = vrot.slane %v1517_v37, 1  ;;  %v1805_v53 = vadd.f32 %v1804_v21, %v1803_v44  ;;  %v1809_v55 = vadd.f32 %v1808_v36, %v1656_v8  ;;  %v1652_v2 = vmul.f32 %v2402_v23, %v1605_v22 }
 0x442   : > { %v1800_v16 = vrot.slane %v1799_v20, 1  ;;  %v1815_v42 = vadd.f32 %v1814_v29, %v1657_v41  ;;  %v1653_v1 = vmul.f32 %v2403_v3, %v1605_v22  ;;  %v3563_v6 = vsel %vm790_vm1, %v1875_v56, %v1873_v10  ;;  %v2404_v41 = vld [vmem:[%s2676_s5 + $0x1f0] sm:$0xff] }
 0x443   : > { %v1806_v24 = vrot.slane %v1805_v53, 1  ;;  %v1810_v11 = vrot.slane %v1809_v55, 2  ;;  %v1987_v35 = vperm.slane %v1605_v22, %v2838_v28  ;;  %v1993_v8 = vperm.slane %v3536_v51, %v2838_v28 }
 0x444   : > { %v1816_v62 = vrot.slane %v1815_v42, 2  ;;  %v1784_v58 = vrot.slane %v1652_v2, 4  ;;  %v1790_v30 = vrot.slane %v1653_v1, 4  ;;  %v1801_v44 = vadd.f32 %v1800_v16, %v1799_v20  ;;  %v2405_v20 = vld [vmem:[%s2676_s5 + $0x1f8] sm:$0xff]  ;;  %v3580_v16 = vpop.permute.xlu0 %1624 }
 0x445   : > { %v1811_v27 = vadd.f32 %v1810_v11, %v1809_v55  ;;  %v1988_v59 = vsel %vm743_vm0, %v1987_v35, %v1986_v38  ;;  %v1662_v10 = vmul.f32 %v2404_v41, %v3560_v17  ;;  %v1807_v56 = vadd.f32 %v1806_v24, %v1805_v53  ;;  %v2406_v11 = vld [vmem:[%s2676_s5 + $0x1d0] sm:$0xff]  ;;  %v3594_v35 = vpop.permute.xlu2 %1619 }
 0x446   : > { %v1817_v21 = vadd.f32 %v1816_v62, %v1815_v42  ;;  %v1785_v36 = vadd.f32 %v1784_v58, %v1652_v2  ;;  %v1791_v22 = vadd.f32 %v1790_v30, %v1653_v1  ;;  %v3574_v29 = vadd.f32 %v1512_v32, %v1511_v43 }
 0x447   : > { %v3576_v23 = vadd.f32 %v1518_v9, %v1517_v37  ;;  %v1812_v51 = vrot.slane %v1811_v27, 1  ;;  %v1663_v55 = vmul.f32 %v2405_v20, %v3560_v17  ;;  %v3743_v57 = vperm.slane %v3477_v50, %v2833_v26  ;;  %v2408_v20 = vld [vmem:[%s2676_s5 + $0x1b0] sm:$0xff] }
 0x448   : > { %v1786_v53 = vrot.slane %v1785_v36, 2  ;;  %v1792_v42 = vrot.slane %v1791_v22, 2  ;;  %v2012_v43 = vsel %vm792_vm2, %v1988_v59, %v3530_v34  ;;  %v1878_v37 = vadd.f32 %v1801_v44, %v3485_v46 }
 0x449   : > { %v3586_v38 = vsel %vm743_vm0, %v1993_v8, %v3743_v57  ;;  %v1818_v32 = vrot.slane %v1817_v21, 1  ;;  %v1844_v9 = vrot.slane %v1662_v10, 4  ;;  %v1850_v2 = vrot.slane %v1663_v55, 4 }
 0x44a   : > { %v1879_v3 = vadd.f32 %v1807_v56, %v3489_v47  ;;  %v1787_v1 = vadd.f32 %v1786_v53, %v1785_v36  ;;  %v1793_v24 = vadd.f32 %v1792_v42, %v1791_v22  ;;  %v1660_v50 = vmul.f32 %v2406_v11, %v3580_v16  ;;  %v2407_v47 = vld [vmem:[%s2676_s5 + $0x1d8] sm:$0xff] }
 0x44b   : > { %v1813_v62 = vadd.f32 %v1812_v51, %v1811_v27  ;;  %v3597_v8 = vsel %vm794_vm3, %v1991_v0, %v2012_v43  ;;  %v1845_v34 = vadd.f32 %v1844_v9, %v1662_v10  ;;  %v1851_v46 = vadd.f32 %v1850_v2, %v1663_v55 }
 0x44c   : > { %v1788_v58 = vrot.slane %v1787_v1, 1  ;;  %v1794_v30 = vrot.slane %v1793_v24, 1  ;;  %v2002_v44 = vperm.slane %v3560_v17, %v2838_v28  ;;  %v1661_v59 = vmul.f32 %v2407_v47, %v3580_v16 }
 0x44d   : > { %v1819_v41 = vadd.f32 %v1818_v32, %v1817_v21  ;;  %v1846_v56 = vrot.slane %v1845_v34, 2  ;;  %v1852_v36 = vrot.slane %v1851_v46, 2  ;;  %v1832_v27 = vrot.slane %v1660_v50, 4  ;;  %v2409_v32 = vld [vmem:[%s2676_s5 + $0x1b8] sm:$0xff] }
 0x44e   : > { %v1789_v22 = vadd.f32 %v1788_v58, %v1787_v1  ;;  %v1795_v51 = vadd.f32 %v1794_v30, %v1793_v24  ;;  %v1838_v0 = vrot.slane %v1661_v59, 4  ;;  %v1658_v10 = vmul.f32 %v2408_v20, %v3594_v35 }
 0x44f   : > { %v1847_v55 = vadd.f32 %v1846_v56, %v1845_v34  ;;  %v1853_v57 = vadd.f32 %v1852_v36, %v1851_v46  ;;  %v1833_v53 = vadd.f32 %v1832_v27, %v1660_v50  ;;  %v1999_v17 = vperm.slane %v3580_v16, %v2838_v28  ;;  %v1590_v56 = vpop.permute.xlu2 %1589 }
 0x450   : > { %v1876_v21 = vadd.f32 %v1789_v22, %v3473_v39  ;;  %v1877_v42 = vadd.f32 %v1795_v51, %v3483_v63  ;;  %v1839_v43 = vadd.f32 %v1838_v0, %v1661_v59  ;;  %v1659_v9 = vmul.f32 %v2409_v32, %v3594_v35  ;;  %v2411_v0 = vld [vmem:[%s2676_s5 + $0xf8] sm:$0xff] }
 0x451   : > { %v1848_v2 = vrot.slane %v1847_v55, 1  ;;  %v1854_v1 = vrot.slane %v1853_v57, 1  ;;  %v1834_v24 = vrot.slane %v1833_v53, 2  ;;  %v1820_v11 = vrot.slane %v1658_v10, 4 }
 0x452   : > { %v1935_v50 = vsel %vm792_vm2, %v1876_v21, %v3556_v49  ;;  %v1942_v34 = vsel %vm792_vm2, %v1877_v42, %v3563_v6  ;;  %v1840_v16 = vrot.slane %v1839_v43, 2  ;;  %v1826_v46 = vrot.slane %v1659_v9, 4 }
 0x453   : > { %v1880_v39 = vadd.f32 %v1813_v62, %v3532_v7  ;;  %v1881_v63 = vadd.f32 %v1819_v41, %v3543_v40  ;;  %v1849_v58 = vadd.f32 %v1848_v2, %v1847_v55  ;;  %v2003_v49 = vsel %vm743_vm0, %v2002_v44, %v2001_v52 }
 0x454   : > { %v1835_v6 = vadd.f32 %v1834_v24, %v1833_v53  ;;  %v1841_v30 = vadd.f32 %v1840_v16, %v1839_v43  ;;  %v1821_v47 = vadd.f32 %v1820_v11, %v1658_v10  ;;  %v1827_v59 = vadd.f32 %v1826_v46, %v1659_v9 }
 0x455   : > { %v1936_v36 = vsel %vm794_vm3, %v1878_v37, %v1935_v50  ;;  %v1943_v7 = vsel %vm794_vm3, %v1879_v3, %v1942_v34  ;;  %v1855_v40 = vadd.f32 %v1854_v1, %v1853_v57  ;;  %v3745_v62 = vperm.slane %v3465_v33, %v2833_v26  ;;  %v2410_v3 = vld [vmem:[%s2676_s5 + $0xf0] sm:$0xff]  ;;  %s2023_s5 = scalar_lea.sflag [#allocation4], %s2672_s20 }
 0x456   : > { %v1836_v13 = vrot.slane %v1835_v6, 1  ;;  %v1842_v27 = vrot.slane %v1841_v30, 1  ;;  %v1822_v52 = vrot.slane %v1821_v47, 2  ;;  %v1828_v44 = vrot.slane %v1827_v59, 2 }
 0x457   : > { %v2000_v41 = vsel %vm743_vm0, %v1999_v17, %v3745_v62  ;;  %v1886_v22 = vadd.f32 %v1849_v58, %v3574_v29  ;;  %v1996_v37 = vperm.slane %v3594_v35, %v2838_v28  ;;  %v1646_v51 = vmul.f32 %v2410_v3, %v1590_v56 }
 0x458   : > { %v1647_v33 = vmul.f32 %v2411_v0, %v1590_v56  ;;  %v1823_v20 = vadd.f32 %v1822_v52, %v1821_v47  ;;  %v1829_v10 = vadd.f32 %v1828_v44, %v1827_v59  ;;  %v1937_v55 = vsel %vm796_vm4, %v1880_v39, %v1936_v36 }
 0x459   : > { %v2014_v57 = vsel %vm796_vm4, %v3586_v38, %v3597_v8  ;;  %v3746_v29 = vperm.slane %v3449_v14, %v2833_v26  ;;  %v1748_v35 = vrot.slane %v1646_v51, 4  ;;  %v1925_v21 = vsel %vm800_vm6, %v3435_v25, %v3432_v31 }
 0x45a   : > { %v1754_v17 = vrot.slane %v1647_v33, 4  ;;  %v1837_v42 = vadd.f32 %v1836_v13, %v1835_v6  ;;  %v1843_v43 = vadd.f32 %v1842_v27, %v1841_v30  ;;  %v1824_v32 = vrot.slane %v1823_v20, 1 }
 0x45b   : > { %v1997_v53 = vsel %vm743_vm0, %v1996_v37, %v3746_v29  ;;  %v1830_v9 = vrot.slane %v1829_v10, 1  ;;  %v1749_v38 = vadd.f32 %v1748_v35, %v1646_v51  ;;  %v1932_v14 = vsel %vm800_vm6, %v3438_v18, %v3445_v5 }
 0x45c   : > { %v2015_v2 = vsel %vm798_vm5, %v1997_v53, %v2014_v57  ;;  %v1755_v8 = vadd.f32 %v1754_v17, %v1647_v33  ;;  %v1825_v1 = vadd.f32 %v1824_v32, %v1823_v20  ;;  %v1944_v11 = vsel %vm796_vm4, %v1881_v63, %v1943_v7 }
 0x45d   : > { %v1831_v24 = vadd.f32 %v1830_v9, %v1829_v10  ;;  %v1978_v31 = vperm.slane %v1590_v56, %v2838_v28  ;;  %v2016_v25 = vsel %vm800_vm6, %v2000_v41, %v2015_v2  ;;  %v1750_v50 = vrot.slane %v1749_v38, 2 }
 0x45e   : > { %v1756_v34 = vrot.slane %v1755_v8, 2  ;;  %v2009_v16 = vsel %vm800_vm6, %v3428_v15, %v3398_v19  ;;  %v1884_v18 = vadd.f32 %v1837_v42, %v3523_v54  ;;  %v1882_v5 = vadd.f32 %v1825_v1, %v3501_v60 }
 0x45f   : > { %v1883_v46 = vadd.f32 %v1831_v24, %v3506_v45  ;;  %v3747_v28 = vperm.slane %v3246_v61, %v2833_v26  ;;  %v1885_v63 = vadd.f32 %v1843_v43, %v3527_v12  ;;  %v1751_v58 = vadd.f32 %v1750_v50, %v1749_v38 }
 0x460   : > { %v1757_v6 = vadd.f32 %v1756_v34, %v1755_v8  ;;  %v1887_v19 = vadd.f32 %v1855_v40, %v3576_v23  ;;  %v1938_v54 = vsel %vm798_vm5, %v1882_v5, %v1937_v55  ;;  %v2017_v45 = vsel %vm802_vm7, %v2003_v49, %v2016_v25 }
 0x461   : > { %v1979_v39 = vsel %vm743_vm0, %v1978_v31, %v3747_v28  ;;  %v1945_v15 = vsel %vm798_vm5, %v1883_v46, %v1944_v11  ;;  %v1939_v26 = vsel %vm800_vm6, %v1884_v18, %v1938_v54  ;;  %v1752_v60 = vrot.slane %v1751_v58, 1  ;;  %2021 = vst.msk [vmem:[%s250_s11 + $0x8] sm:$0xff] %vm813_vm8, %v2017_v45 }
 0x462   : > { %v2010_v30 = vsel %vm802_vm7, %v1979_v39, %v2009_v16  ;;  %v1946_v61 = vsel %vm800_vm6, %v1885_v63, %v1945_v15  ;;  %v1758_v12 = vrot.slane %v1757_v6, 1  ;;  %v1940_v23 = vsel %vm802_vm7, %v1886_v22, %v1939_v26 }
 0x463   : > { %2020 = vst.msk [vmem:[%s250_s11] sm:$0xff] %vm813_vm8, %v2010_v30  ;;  %v1947_v47 = vsel %vm802_vm7, %v1887_v19, %v1946_v61  ;;  %v3748_v49 = vrot.slane %v3276_v4, 1  ;;  %v3749_v56 = vrot.slane %v3278_v48, 1  ;;  %v1753_v7 = vadd.f32 %v1752_v60, %v1751_v58 }
 0x464   : > { %1954 = vst [vmem:[%s236_s14 + $0x10] sm:$0xff] %v1940_v23  ;;  %v1759_v40 = vadd.f32 %v1758_v12, %v1757_v6 }
 0x465   : > { %v1417_v59 = vadd.f32 %v3748_v49, %v3276_v4  ;;  %v1423_v36 = vadd.f32 %v3749_v56, %v3278_v48  ;;  %1955 = vst [vmem:[%s236_s14 + $0x18] sm:$0xff] %v1947_v47 }
 0x467   : > { %v1870_v62 = vadd.f32 %v1753_v7, %v1417_v59  ;;  %v1871_v41 = vadd.f32 %v1759_v40, %v1423_v36 }
 0x469   : > { %v1926_v4 = vsel %vm802_vm7, %v1870_v62, %v1925_v21  ;;  %v1933_v13 = vsel %vm802_vm7, %v1871_v41, %v1932_v14 }
 0x46a   : > { %1952 = vst [vmem:[%s236_s14] sm:$0xff] %v1926_v4 }
 0x46b   : > { %1953 = vst [vmem:[%s236_s14 + $0x8] sm:$0xff] %v1933_v13 }
 0x46c   : > { %2499 = shalt.err (!%p2496_p12)
}
 0x46d   : > { %s2550_s20 = smov 256   ;;  %s2551_s7 = smov 16  }
 0x46e   : > { %2218 = dma.vmem_to_hbm [thread:$0]  (%p2644_p7), %s2042_s24, 512, %s2044_s30, %s2023_s5, %s2550_s20, %s2550_s20, %s2551_s7  }
 0x46f PF: > { %s2062_s11 = sand.u32 1, %s2530_s15   ;;  %p3750_p13 = scmp.ge.s32.totalorder %s2542_s18, 2 }
 0x470   : > { %s2063_s12 = scalar_lea.sflag [#allocation4], %s2062_s11 }
 0x471   : > { %p2229_p0 = pnand %p3750_p13, %p2612_p6 }
 0x473   : > { %p2230_p3 = pneg %p2229_p0 }
 0x475   : > { %2525 = dma.done.wait (%p2230_p3), %s2063_s12, 512  }
 0x476   : > { %2527 = vsyncadd (%p2230_p3), %s2063_s12, 4294966784  ;;  %p19_p5 = scmp.ge.s32.totalorder %s2630_s29, 4   ;;  %s3751_s15 = smov %s2534_s16 }
 0x477   : > { %s3752_s16 = smov %s2538_s17  ;;  %s3753_s17 = smov %s2640_s8 }
 0x478   : > { %s3754_s18 = smov %s2630_s29  ;;  %21 = sbr.rel (!%p19_p5) target bundleno = 6 (0x6), region = 93 }
 0x47d   :  { %2077 = vsyncpa [#allocation3], 1 }
 0x47e   :  { %2079 = vsyncpa [#allocation3 + $0x1], 1 }
 0x47f   :  { %2080 = vsyncpa [#allocation6], 1 }
 0x480   :  { %2081 = vsyncpa [#allocation4], 1 }
 0x481   :  { %2083 = vsyncpa [#allocation4 + $0x1], 1 }

</bundles_post_ra>
